<compile_context>
chip_gen: v6e
topology: v6e:2x2x1
jax: 0.10.0
libtpu: 0.0.40
codegen_flags: <defaults>
</compile_context>

<pallas_src>
import jax
import jax.numpy as jnp
from jax import lax
from jax.experimental import pallas as pl
from jax.experimental.pallas import tpu as pltpu

# VAT hyperparameters (match the PyTorch defaults)
XI = 10.0
EPS_VAT = 1.0
IP = 2
TEMP = 1.0

LOG_EPS = 1e-16    # stabilizer inside KL logs (KL_div helper style)
NORM_EPS = 1e-8    # stabilizer in _l2_normalize
LOSS_LANES = 128   # lane-dense partial-loss output width


def _l2_normalize_rows(v):
    # rsqrt runs on the EUP slot (co-issues with VPU work) -> one vmul/elt.
    sumsq = jnp.sum(v * v, axis=-1, keepdims=True)
    return v * lax.rsqrt(sumsq + NORM_EPS * NORM_EPS)


def _vat_fused_kernel(x_ref, d0_ref, w_ref, b_ref, pred_ref, loss_ref):
    """Fused VAT: ip power iterations + final partial KL for one batch tile.

    x_ref    : VMEM (TN, D) bf16  flattened inputs (consumed ONCE, for z0)
    d0_ref   : VMEM (TN, D) bf16  raw randn direction (normalized in-kernel)
    w_ref    : VMEM (D, C)  bf16  classifier weights (whole array)
    b_ref    : VMEM (1, C)  f32   classifier bias
    pred_ref : VMEM (TN, C) f32   clean-model simplex predictions (tile)
    loss_ref : VMEM (1, LOSS_LANES) f32  tile's partial KL sum (lane-broadcast)
    """
    w = w_ref[...]                 # (D, C) bf16  (MXU operand)
    b = b_ref[...]                 # (1, C) f32
    p = pred_ref[...]              # (TN, C) f32
    inv_temp = 1.0 / TEMP

    # Model linearity: logits(x + a*d) = z0 + a * (d @ W) / temp.
    z0 = (jnp.dot(x_ref[...], w, preferred_element_type=jnp.float32)
          + b) * inv_temp                                          # (TN, C)

    def dir_logits(dv):
        return jnp.dot(dv.astype(jnp.bfloat16), w,
                       preferred_element_type=jnp.float32) * inv_temp

    # ---- initial d ~ randn_like(x), per-sample l2-normalized -------------
    d = _l2_normalize_rows(d0_ref[...].astype(jnp.float32))        # (TN, D)

    # ---- ip power iterations (analytic grad of KL(p||q) w.r.t. d) --------
    for _ in range(IP):
        z = z0 + XI * dir_logits(d)                                # (TN, C)
        z = z - jnp.max(z, axis=-1, keepdims=True)
        e = jnp.exp(z)
        q = e / jnp.sum(e, axis=-1, keepdims=True)
        # dL/dd = (xi/(N*temp)) * (q - p) @ W^T ; the positive scalar is
        # dropped because d is re-normalized immediately afterwards.
        g = lax.dot_general((q - p).astype(jnp.bfloat16), w,
                            dimension_numbers=(((1,), (1,)), ((), ())),
                            preferred_element_type=jnp.float32)    # (TN, D)
        d = _l2_normalize_rows(g)

    # ---- final LDS contribution of this tile ------------------------------
    # KL(p || softmax((x + eps*d)@W + b)/temp) with the reference's
    # log(q + 1e-16) stabilizer, summed over this tile's rows.
    z = z0 + EPS_VAT * dir_logits(d)
    z = z - jnp.max(z, axis=-1, keepdims=True)
    e = jnp.exp(z)
    q = e / jnp.sum(e, axis=-1, keepdims=True)
    kl = p * (jnp.log(p + LOG_EPS) - jnp.log(q + LOG_EPS))         # (TN, C)

    row_kl = jnp.sum(kl, axis=-1, keepdims=True)                   # (TN, 1)
    partial = jnp.sum(row_kl, axis=0, keepdims=True)               # (1, 1)
    # Lane-dense store (no masked (1,1) vst).
    loss_ref[...] = jnp.broadcast_to(partial, loss_ref.shape).astype(jnp.float32)


def _pick_tile_n(n, d_dim, vmem_target_bytes=24 * 1024 * 1024):
    """Batch tile sized from the VMEM budget (not just divisibility).

    Live per-row working set ~= 3 concurrently-live f32 (TN, D) temporaries
    (d, g, squared values) + double-buffered bf16 x and d0 tiles:
    ~ (3*4 + 2*2*2) * D = 20 * D bytes per row.
    """
    bytes_per_row = 20 * d_dim
    max_tn = max(16, vmem_target_bytes // max(bytes_per_row, 1))
    cands = [t for t in range(16, min(max_tn, n) + 1, 16) if n % t == 0]
    if not cands:
        return n  # small / odd batch: one full-batch tile (layout-legal)
    multi = [t for t in cands if n // t >= 2]   # keep both v7x TCs busy
    return max(multi) if multi else max(cands)


def vat_loss(x_nchw, pred, w, b, seed=0):
    """Full VATLoss.forward equivalent for the synthetic linear-softmax model."""
    n = x_nchw.shape[0]
    x_flat = x_nchw.reshape(n, -1)
    d_dim = x_flat.shape[1]
    num_classes = w.shape[1]

    # bf16 feeds for the big (N, D) arrays (halve DMA / MXU operand traffic);
    # all softmax / KL / normalization math in the kernel stays f32 (v5e-safe).
    x_bf = x_flat.astype(jnp.bfloat16)
    w_bf = w.astype(jnp.bfloat16)
    b_f = b.reshape(1, num_classes).astype(jnp.float32)
    pred_f = pred.astype(jnp.float32)

    # d ~ randn_like(x): drawn with the standard JAX PRNG (the TPU hardware
    # PRNG has no interpret/CPU lowering); per-sample normalization happens
    # inside the kernel.
    d0 = jax.random.normal(jax.random.PRNGKey(seed), (n, d_dim),
                           dtype=jnp.float32).astype(jnp.bfloat16)

    tile_n = _pick_tile_n(n, d_dim)
    num_tiles = n // tile_n

    # TODO(synk): for very large D (full-resolution images) add a D-tiling
    # grid axis ("arbitrary") with a VMEM logits accumulator; D is whole here.
    grid_spec = pltpu.PrefetchScalarGridSpec(
        num_scalar_prefetch=0,
        grid=(num_tiles,),
        in_specs=[
            pl.BlockSpec((tile_n, d_dim), lambda i: (i, 0)),        # x tile
            pl.BlockSpec((tile_n, d_dim), lambda i: (i, 0)),        # d0 tile
            pl.BlockSpec((d_dim, num_classes), lambda i: (0, 0)),   # W (whole)
            pl.BlockSpec((1, num_classes), lambda i: (0, 0)),       # b (whole)
            pl.BlockSpec((tile_n, num_classes), lambda i: (i, 0)),  # pred tile
        ],
        out_specs=pl.BlockSpec((1, LOSS_LANES), lambda i: (i, 0)),
    )

    partials = pl.pallas_call(
        _vat_fused_kernel,
        out_shape=jax.ShapeDtypeStruct((num_tiles, LOSS_LANES), jnp.float32),
        grid_spec=grid_spec,
        compiler_params=pltpu.CompilerParams(
            dimension_semantics=("parallel",),        # batch tiles independent
            vmem_limit_bytes=48 * 1024 * 1024,        # safe on v5e/v6e/v7x
        ),
    )(x_bf, d0, w_bf, b_f, pred_f)

    # mean over the batch (tiny reduction over num_tiles partial sums)
    return jnp.sum(partials[:, 0]) / n


if __name__ == "__main__":
    key = jax.random.PRNGKey(0)
    kx, kw, kb = jax.random.split(key, 3)

    N, CH, H, W = 2, 4, 16, 16
    NUM_CLASSES = 8
    D = CH * H * W

    # deterministic synthetic inputs / model parameters
    x = jax.random.normal(kx, (N, CH, H, W), dtype=jnp.float32)
    w = jax.random.normal(kw, (D, NUM_CLASSES), dtype=jnp.float32) * 0.05
    b = jax.random.normal(kb, (1, NUM_CLASSES), dtype=jnp.float32) * 0.01

    # pred (the clean-model simplex prediction passed into VATLoss.forward)
    x_flat = x.reshape(N, -1)
    pred = jax.nn.softmax((x_flat @ w + b) / TEMP, axis=-1)

    # TODO(synk): _disable_tracking_bn_stats has no effect here (no BN in the
    # synthetic linear model), so it is intentionally a no-op.
    lds = vat_loss(x, pred, w, b, seed=0)
    jax.block_until_ready(lds)
    assert bool(jnp.isfinite(lds))
    print("KERNEL_OK")
</pallas_src>

<mosaic_0001>
module attributes {stable_mosaic.version = 11 : i64} {
  func.func @_vat_fused_kernel(%arg0: i32, %arg1: memref<2x1024xbf16, #tpu.memory_space<vmem>>, %arg2: memref<2x1024xbf16, #tpu.memory_space<vmem>>, %arg3: memref<1024x8xbf16, #tpu.memory_space<vmem>>, %arg4: memref<1x8xf32, #tpu.memory_space<vmem>>, %arg5: memref<2x8xf32, #tpu.memory_space<vmem>>, %arg6: memref<1x128xf32, #tpu.memory_space<vmem>>) attributes {dimension_semantics = [#tpu.dimension_semantics<parallel>], iteration_bounds = array<i64: 1>, scalar_prefetch = 0 : i64, scratch_operands = 0 : i64, tpu.core_type = #tpu.core_type<tc>, window_params = [{transform_indices = @transform_0, window_bounds = array<i64: 2, 1024>}, {transform_indices = @transform_1, window_bounds = array<i64: 2, 1024>}, {pipeline_mode = #tpu.pipeline_mode<synchronous>, transform_indices = @transform_2, window_bounds = array<i64: 1024, 8>}, {pipeline_mode = #tpu.pipeline_mode<synchronous>, transform_indices = @transform_3, window_bounds = array<i64: 1, 8>}, {transform_indices = @transform_4, window_bounds = array<i64: 2, 8>}, {transform_indices = @transform_5, window_bounds = array<i64: 1, 128>}]} {
    %c0 = arith.constant 0 : index
    %c0_0 = arith.constant 0 : index
    %0 = vector.load %arg3[%c0, %c0_0] : memref<1024x8xbf16, #tpu.memory_space<vmem>>, vector<1024x8xbf16>
    %c0_1 = arith.constant 0 : index
    %c0_2 = arith.constant 0 : index
    %1 = vector.load %arg4[%c0_1, %c0_2] : memref<1x8xf32, #tpu.memory_space<vmem>>, vector<1x8xf32>
    %c0_3 = arith.constant 0 : index
    %c0_4 = arith.constant 0 : index
    %2 = vector.load %arg5[%c0_3, %c0_4] : memref<2x8xf32, #tpu.memory_space<vmem>>, vector<2x8xf32>
    %c0_5 = arith.constant 0 : index
    %c0_6 = arith.constant 0 : index
    %3 = vector.load %arg1[%c0_5, %c0_6] : memref<2x1024xbf16, #tpu.memory_space<vmem>>, vector<2x1024xbf16>
    %cst = arith.constant dense<0.000000e+00> : vector<2x8xf32>
    %4 = tpu.matmul %3, %0, %cst {dimension_numbers = #tpu.dot_dimension_numbers<[1], [0], [0], [1], [0, 0, 1, 1], [], []>} : vector<2x1024xbf16>, vector<1024x8xbf16>, vector<2x8xf32> -> vector<2x8xf32>
    %5 = vector.broadcast %1 : vector<1x8xf32> to vector<2x8xf32>
    %6 = arith.addf %4, %5 : vector<2x8xf32>
    %cst_7 = arith.constant 1.000000e+00 : f32
    %7 = vector.broadcast %cst_7 : f32 to vector<2x8xf32>
    %8 = arith.mulf %6, %7 : vector<2x8xf32>
    %c0_8 = arith.constant 0 : index
    %c0_9 = arith.constant 0 : index
    %9 = vector.load %arg2[%c0_8, %c0_9] : memref<2x1024xbf16, #tpu.memory_space<vmem>>, vector<2x1024xbf16>
    %10 = arith.extf %9 : vector<2x1024xbf16> to vector<2x1024xf32>
    %11 = arith.mulf %10, %10 : vector<2x1024xf32>
    %cst_10 = arith.constant dense<0.000000e+00> : vector<2xf32>
    %12 = vector.multi_reduction <add>, %11, %cst_10 [1] : vector<2x1024xf32> to vector<2xf32>
    %13 = vector.shape_cast %12 : vector<2xf32> to vector<2x1xf32>
    %cst_11 = arith.constant 1.000000e-16 : f32
    %14 = vector.broadcast %cst_11 : f32 to vector<2x1xf32>
    %15 = arith.addf %13, %14 : vector<2x1xf32>
    %16 = math.rsqrt %15 : vector<2x1xf32>
    %17 = vector.broadcast %16 : vector<2x1xf32> to vector<2x1024xf32>
    %18 = arith.mulf %10, %17 : vector<2x1024xf32>
    %19 = arith.truncf %18 : vector<2x1024xf32> to vector<2x1024xbf16>
    %cst_12 = arith.constant dense<0.000000e+00> : vector<2x8xf32>
    %20 = tpu.matmul %19, %0, %cst_12 {dimension_numbers = #tpu.dot_dimension_numbers<[1], [0], [0], [1], [0, 0, 1, 1], [], []>} : vector<2x1024xbf16>, vector<1024x8xbf16>, vector<2x8xf32> -> vector<2x8xf32>
    %cst_13 = arith.constant 1.000000e+00 : f32
    %21 = vector.broadcast %cst_13 : f32 to vector<2x8xf32>
    %22 = arith.mulf %20, %21 : vector<2x8xf32>
    %cst_14 = arith.constant 1.000000e+01 : f32
    %23 = vector.broadcast %cst_14 : f32 to vector<2x8xf32>
    %24 = arith.mulf %23, %22 : vector<2x8xf32>
    %25 = arith.addf %8, %24 : vector<2x8xf32>
    %cst_15 = arith.constant dense<0xFF800000> : vector<2xf32>
    %26 = vector.multi_reduction <maximumf>, %25, %cst_15 [1] : vector<2x8xf32> to vector<2xf32>
    %27 = vector.shape_cast %26 : vector<2xf32> to vector<2x1xf32>
    %28 = vector.broadcast %27 : vector<2x1xf32> to vector<2x8xf32>
    %29 = arith.subf %25, %28 : vector<2x8xf32>
    %30 = math.exp %29 : vector<2x8xf32>
    %cst_16 = arith.constant dense<0.000000e+00> : vector<2xf32>
    %31 = vector.multi_reduction <add>, %30, %cst_16 [1] : vector<2x8xf32> to vector<2xf32>
    %32 = vector.shape_cast %31 : vector<2xf32> to vector<2x1xf32>
    %33 = vector.broadcast %32 : vector<2x1xf32> to vector<2x8xf32>
    %34 = arith.divf %30, %33 : vector<2x8xf32>
    %35 = arith.subf %34, %2 : vector<2x8xf32>
    %36 = arith.truncf %35 : vector<2x8xf32> to vector<2x8xbf16>
    %cst_17 = arith.constant dense<0.000000e+00> : vector<2x1024xf32>
    %37 = tpu.matmul %36, %0, %cst_17 {dimension_numbers = #tpu.dot_dimension_numbers<[1], [1], [0], [0], [0, 0, 1, 0], [], []>} : vector<2x8xbf16>, vector<1024x8xbf16>, vector<2x1024xf32> -> vector<2x1024xf32>
    %38 = arith.mulf %37, %37 : vector<2x1024xf32>
    %cst_18 = arith.constant dense<0.000000e+00> : vector<2xf32>
    %39 = vector.multi_reduction <add>, %38, %cst_18 [1] : vector<2x1024xf32> to vector<2xf32>
    %40 = vector.shape_cast %39 : vector<2xf32> to vector<2x1xf32>
    %cst_19 = arith.constant 1.000000e-16 : f32
    %41 = vector.broadcast %cst_19 : f32 to vector<2x1xf32>
    %42 = arith.addf %40, %41 : vector<2x1xf32>
    %43 = math.rsqrt %42 : vector<2x1xf32>
    %44 = vector.broadcast %43 : vector<2x1xf32> to vector<2x1024xf32>
    %45 = arith.mulf %37, %44 : vector<2x1024xf32>
    %46 = arith.truncf %45 : vector<2x1024xf32> to vector<2x1024xbf16>
    %cst_20 = arith.constant dense<0.000000e+00> : vector<2x8xf32>
    %47 = tpu.matmul %46, %0, %cst_20 {dimension_numbers = #tpu.dot_dimension_numbers<[1], [0], [0], [1], [0, 0, 1, 1], [], []>} : vector<2x1024xbf16>, vector<1024x8xbf16>, vector<2x8xf32> -> vector<2x8xf32>
    %cst_21 = arith.constant 1.000000e+00 : f32
    %48 = vector.broadcast %cst_21 : f32 to vector<2x8xf32>
    %49 = arith.mulf %47, %48 : vector<2x8xf32>
    %cst_22 = arith.constant 1.000000e+01 : f32
    %50 = vector.broadcast %cst_22 : f32 to vector<2x8xf32>
    %51 = arith.mulf %50, %49 : vector<2x8xf32>
    %52 = arith.addf %8, %51 : vector<2x8xf32>
    %cst_23 = arith.constant dense<0xFF800000> : vector<2xf32>
    %53 = vector.multi_reduction <maximumf>, %52, %cst_23 [1] : vector<2x8xf32> to vector<2xf32>
    %54 = vector.shape_cast %53 : vector<2xf32> to vector<2x1xf32>
    %55 = vector.broadcast %54 : vector<2x1xf32> to vector<2x8xf32>
    %56 = arith.subf %52, %55 : vector<2x8xf32>
    %57 = math.exp %56 : vector<2x8xf32>
    %cst_24 = arith.constant dense<0.000000e+00> : vector<2xf32>
    %58 = vector.multi_reduction <add>, %57, %cst_24 [1] : vector<2x8xf32> to vector<2xf32>
    %59 = vector.shape_cast %58 : vector<2xf32> to vector<2x1xf32>
    %60 = vector.broadcast %59 : vector<2x1xf32> to vector<2x8xf32>
    %61 = arith.divf %57, %60 : vector<2x8xf32>
    %62 = arith.subf %61, %2 : vector<2x8xf32>
    %63 = arith.truncf %62 : vector<2x8xf32> to vector<2x8xbf16>
    %cst_25 = arith.constant dense<0.000000e+00> : vector<2x1024xf32>
    %64 = tpu.matmul %63, %0, %cst_25 {dimension_numbers = #tpu.dot_dimension_numbers<[1], [1], [0], [0], [0, 0, 1, 0], [], []>} : vector<2x8xbf16>, vector<1024x8xbf16>, vector<2x1024xf32> -> vector<2x1024xf32>
    %65 = arith.mulf %64, %64 : vector<2x1024xf32>
    %cst_26 = arith.constant dense<0.000000e+00> : vector<2xf32>
    %66 = vector.multi_reduction <add>, %65, %cst_26 [1] : vector<2x1024xf32> to vector<2xf32>
    %67 = vector.shape_cast %66 : vector<2xf32> to vector<2x1xf32>
    %cst_27 = arith.constant 1.000000e-16 : f32
    %68 = vector.broadcast %cst_27 : f32 to vector<2x1xf32>
    %69 = arith.addf %67, %68 : vector<2x1xf32>
    %70 = math.rsqrt %69 : vector<2x1xf32>
    %71 = vector.broadcast %70 : vector<2x1xf32> to vector<2x1024xf32>
    %72 = arith.mulf %64, %71 : vector<2x1024xf32>
    %73 = arith.truncf %72 : vector<2x1024xf32> to vector<2x1024xbf16>
    %cst_28 = arith.constant dense<0.000000e+00> : vector<2x8xf32>
    %74 = tpu.matmul %73, %0, %cst_28 {dimension_numbers = #tpu.dot_dimension_numbers<[1], [0], [0], [1], [0, 0, 1, 1], [], []>} : vector<2x1024xbf16>, vector<1024x8xbf16>, vector<2x8xf32> -> vector<2x8xf32>
    %cst_29 = arith.constant 1.000000e+00 : f32
    %75 = vector.broadcast %cst_29 : f32 to vector<2x8xf32>
    %76 = arith.mulf %74, %75 : vector<2x8xf32>
    %cst_30 = arith.constant 1.000000e+00 : f32
    %77 = vector.broadcast %cst_30 : f32 to vector<2x8xf32>
    %78 = arith.mulf %77, %76 : vector<2x8xf32>
    %79 = arith.addf %8, %78 : vector<2x8xf32>
    %cst_31 = arith.constant dense<0xFF800000> : vector<2xf32>
    %80 = vector.multi_reduction <maximumf>, %79, %cst_31 [1] : vector<2x8xf32> to vector<2xf32>
    %81 = vector.shape_cast %80 : vector<2xf32> to vector<2x1xf32>
    %82 = vector.broadcast %81 : vector<2x1xf32> to vector<2x8xf32>
    %83 = arith.subf %79, %82 : vector<2x8xf32>
    %84 = math.exp %83 : vector<2x8xf32>
    %cst_32 = arith.constant dense<0.000000e+00> : vector<2xf32>
    %85 = vector.multi_reduction <add>, %84, %cst_32 [1] : vector<2x8xf32> to vector<2xf32>
    %86 = vector.shape_cast %85 : vector<2xf32> to vector<2x1xf32>
    %87 = vector.broadcast %86 : vector<2x1xf32> to vector<2x8xf32>
    %88 = arith.divf %84, %87 : vector<2x8xf32>
    %cst_33 = arith.constant 1.000000e-16 : f32
    %89 = vector.broadcast %cst_33 : f32 to vector<2x8xf32>
    %90 = arith.addf %2, %89 : vector<2x8xf32>
    %91 = math.log %90 : vector<2x8xf32>
    %cst_34 = arith.constant 1.000000e-16 : f32
    %92 = vector.broadcast %cst_34 : f32 to vector<2x8xf32>
    %93 = arith.addf %88, %92 : vector<2x8xf32>
    %94 = math.log %93 : vector<2x8xf32>
    %95 = arith.subf %91, %94 : vector<2x8xf32>
    %96 = arith.mulf %2, %95 : vector<2x8xf32>
    %cst_35 = arith.constant dense<0.000000e+00> : vector<2xf32>
    %97 = vector.multi_reduction <add>, %96, %cst_35 [1] : vector<2x8xf32> to vector<2xf32>
    %98 = vector.shape_cast %97 : vector<2xf32> to vector<2x1xf32>
    %cst_36 = arith.constant dense<0.000000e+00> : vector<1xf32>
    %99 = vector.multi_reduction <add>, %98, %cst_36 [0] : vector<2x1xf32> to vector<1xf32>
    %100 = vector.shape_cast %99 : vector<1xf32> to vector<1x1xf32>
    %101 = vector.shape_cast %100 : vector<1x1xf32> to vector<1x1xf32>
    %102 = vector.broadcast %101 : vector<1x1xf32> to vector<1x128xf32>
    %c0_37 = arith.constant 0 : index
    %c0_38 = arith.constant 0 : index
    %103 = vector.load %arg6[%c0_37, %c0_38] : memref<1x128xf32, #tpu.memory_space<vmem>>, vector<1x128xf32>
    tpu.vector_store %arg6[%c0_37, %c0_38], %102 {strides = array<i32>} : memref<1x128xf32, #tpu.memory_space<vmem>>, vector<1x128xf32>,
    return
  }
  func.func @transform_0(%arg0: i32) -> (i32, i32) {
    %c0_i32 = arith.constant 0 : i32
    %c0_i32_0 = arith.constant 0 : i32
    return %arg0, %c0_i32 : i32, i32
  }
  func.func @transform_1(%arg0: i32) -> (i32, i32) {
    %c0_i32 = arith.constant 0 : i32
    %c0_i32_0 = arith.constant 0 : i32
    return %arg0, %c0_i32 : i32, i32
  }
  func.func @transform_2(%arg0: i32) -> (i32, i32) {
    %c0_i32 = arith.constant 0 : i32
    %c0_i32_0 = arith.constant 0 : i32
    %c0_i32_1 = arith.constant 0 : i32
    return %c0_i32, %c0_i32_0 : i32, i32
  }
  func.func @transform_3(%arg0: i32) -> (i32, i32) {
    %c0_i32 = arith.constant 0 : i32
    %c0_i32_0 = arith.constant 0 : i32
    %c0_i32_1 = arith.constant 0 : i32
    return %c0_i32, %c0_i32_0 : i32, i32
  }
  func.func @transform_4(%arg0: i32) -> (i32, i32) {
    %c0_i32 = arith.constant 0 : i32
    %c0_i32_0 = arith.constant 0 : i32
    return %arg0, %c0_i32 : i32, i32
  }
  func.func @transform_5(%arg0: i32) -> (i32, i32) {
    %c0_i32 = arith.constant 0 : i32
    %c0_i32_0 = arith.constant 0 : i32
    return %arg0, %c0_i32 : i32, i32
  }
}

</mosaic_0001>

<bundles_post_ra>
// kernel: tpu_custom_call.1
= control target key start
LH: loop header
LB: loop body
LE: loop exit
PB: predicated region body
PF: predicated region fallthrough
CT: control target
= control target key end

     0   :  { %v164_v0 = vlaneseq  ;;  %v2872_v4 = vmov 1983009808   ;;  %vm810_vm0 = vcmask 1041408   ;;  %s4182_s0 = inlined_call_operand.vmem [shape: bf16[2,1024], index: 0, kind: input, shape index: {}]   ;;  %s4183_s1 = inlined_call_operand.vmem [shape: bf16[2,1024], index: 1, kind: input, shape index: {}]   ;;  %s4184_s2 = inlined_call_operand.vmem [shape: bf16[1024,8], index: 2, kind: input, shape index: {}]   ;;  %s4185_s3 = inlined_call_operand.vmem [shape: f32[1,8], index: 3, kind: input, shape index: {}]   ;;  %s4186_s4 = inlined_call_operand.vmem [shape: f32[2,8], index: 4, kind: input, shape index: {}]   ;;  %s4187_s5 = inlined_call_operand.hbm [shape: f32[1,128], index: 5, kind: output, shape index: {}]  }
   0x1   :  { %v761_v1 = vld [vmem:[%s4183_s1] sm:$0xff]  ;;  %v770_v5 = vunpack.c.l.s4 %v2872_v4  ;;  %v2916_v6 = vld [vmem:[%s4184_s2 + $0x78] sm:$0xff]   ;;  %v2948_v16 = vld [vmem:[%s4184_s2 + $0x70] sm:$0xff]  }
   0x2   :  { %v2909_v2 = vunpack.c.l.bf16 %v761_v1  ;;  %v2911_v3 = vunpack.c.h.bf16 %v761_v1  ;;  %v2918_v7 = vshrl.u32 %v164_v0, 7  ;;  %v2923_v8 = vld [vmem:[%s4184_s2 + $0x38] sm:$0xff]   ;;  %2135 = vmatprep.subr.bf16.mxu0 %v2916_v6  ;;  %v2954_v17 = vld [vmem:[%s4184_s2 + $0x30] sm:$0xff]   ;;  %v2975_v26 = vld [vmem:[%s4184_s2 + $0x68] sm:$0xff]  }
   0x3   :  { %v771_v10 = vunpack.c.0.s8 %v770_v5  ;;  %v2931_v11 = vld [vmem:[%s4184_s2 + $0xf8] sm:$0xff]   ;;  %2136 = vmatpush3.bf16.msra.mxu0 %v2923_v8  ;;  %v2962_v20 = vld [vmem:[%s4184_s2 + $0xf0] sm:$0xff]   ;;  %v2985_v30 = vld [vmem:[%s4184_s2 + $0x28] sm:$0xff]  }
   0x4   :  { %v764_v9 = vmul.f32 %v2909_v2, %v2909_v2  ;;  %v2937_v12 = vld [vmem:[%s4184_s2 + $0xb8] sm:$0xff]   ;;  %v765_v13 = vmul.f32 %v2911_v3, %v2911_v3  ;;  %2157 = vmatprep.subr.bf16.mxu1 %v2931_v11  ;;  %2137 = vmatprep.subr.bf16.mxu0 %v2948_v16  ;;  %v2968_v21 = vld [vmem:[%s4184_s2 + $0xb0] sm:$0xff]   ;;  %v2990_v31 = vld [vmem:[%s4184_s2 + $0xe8] sm:$0xff]  }
   0x5   :  { %v2942_v15 = vsub.s32 %v771_v10, %v2918_v7  ;;  %2158 = vmatpush3.bf16.msra.mxu1 %v2937_v12  ;;  %v2999_v36 = vld [vmem:[%s4184_s2 + $0xa8] sm:$0xff]   ;;  %v3004_v38 = vld [vmem:[%s4184_s2 + $0x60] sm:$0xff]   ;;  %v3030_v47 = vld [vmem:[%s4184_s2 + $0x58] sm:$0xff]  }
   0x6   :  { %v768_v14 = vcombine.high %v764_v9, %v764_v9  ;;  %v785_v24 = vcombine.high %v765_v13, %v765_v13  ;;  %2159 = vmatprep.subr.bf16.mxu1 %v2962_v20  ;;  %v3011_v40 = vld [vmem:[%s4184_s2 + $0x20] sm:$0xff]   ;;  %v3037_v49 = vld [vmem:[%s4184_s2 + $0x18] sm:$0xff]   ;;  %v3056_v55 = vld [vmem:[%s4184_s2 + $0x50] sm:$0xff]  }
   0x7   :  { %v775_v18 = vrot.slane %v764_v9, %v2942_v15  ;;  %2138 = vmatpush3.bf16.msra.mxu0 %v2954_v17  ;;  %v792_v25 = vrot.slane %v765_v13, %v2942_v15  ;;  %v3017_v42 = vld [vmem:[%s4184_s2 + $0xe0] sm:$0xff]   ;;  %v3043_v51 = vld [vmem:[%s4184_s2 + $0xd8] sm:$0xff]   ;;  %v3062_v56 = vld [vmem:[%s4184_s2 + $0x10] sm:$0xff]   ;;  %v2873_v9 = vmov 1966171168  }
   0x8   :  { %v782_v19 = vrot.slane %v768_v14, %v2942_v15  ;;  %2139 = vmatprep.subr.bf16.mxu0 %v2975_v26  ;;  %v799_v33 = vrot.slane %v785_v24, %v2942_v15  ;;  %v3024_v45 = vld [vmem:[%s4184_s2 + $0xa0] sm:$0xff]   ;;  %v3050_v53 = vld [vmem:[%s4184_s2 + $0x98] sm:$0xff]   ;;  %v3068_v58 = vld [vmem:[%s4184_s2 + $0xd0] sm:$0xff]   ;;  %v162_v10 = vunpack.c.l.s4 %v2873_v9 }
   0x9   :  { %v783_v22 = vcombine.high %v775_v18, %v775_v18  ;;  %v811_v27 = vsel %vm810_vm0, %v775_v18, 0.0  ;;  %2160 = vmatpush3.bf16.msra.mxu1 %v2968_v21  ;;  %v800_v34 = vcombine.high %v792_v25, %v792_v25  ;;  %v818_v39 = vsel %vm810_vm0, %v792_v25, 0.0  ;;  %v3074_v59 = vld [vmem:[%s4184_s2 + $0x90] sm:$0xff]   ;;  %v3080_v60 = vld [vmem:[%s4184_s2 + $0x48] sm:$0xff]   ;;  %v3104_v0 = vld [vmem:[%s4184_s2 + $0x40] sm:$0xff]  }
   0xa   :  { %v784_v23 = vcombine.high %v782_v19, %v782_v19  ;;  %v814_v29 = vsel %vm810_vm0, %v782_v19, 0.0  ;;  %2161 = vmatprep.subr.bf16.mxu1 %v2990_v31  ;;  %v801_v43 = vcombine.high %v799_v33, %v799_v33  ;;  %v822_v48 = vsel %vm810_vm0, %v799_v33, 0.0  ;;  %4288 = vst [vmem:[#allocation5_spill] sm:$0xff] %v3074_v59  ;;  %4289 = vst [vmem:[#allocation6_spill] sm:$0xff] %v3080_v60  ;;  %v3086_v61 = vld [vmem:[%s4184_s2 + $0x8] sm:$0xff]   ;;  %v3110_v1 = vld [vmem:[%s4184_s2] sm:$0xff]  }
   0xb   :  { %v812_v28 = vsel %vm810_vm0, %v783_v22, 0.0  ;;  %2140 = vmatpush3.bf16.msra.mxu0 %v2985_v30  ;;  %v820_v44 = vsel %vm810_vm0, %v800_v34, 0.0  ;;  %4290 = vst [vmem:[#allocation7_spill] sm:$0xff] %v3086_v61  ;;  %v3092_v62 = vld [vmem:[%s4184_s2 + $0xc8] sm:$0xff]   ;;  %4293 = vst [vmem:[#allocation10_spill] sm:$0xff] %v3104_v0  ;;  %v3116_v4 = vld [vmem:[%s4184_s2 + $0xc0] sm:$0xff]   ;;  %v163_v19 = vunpack.c.0.s8 %v162_v10 }
   0xc   :  { %v813_v32 = vadd.f32 %v812_v28, %v811_v27  ;;  %v816_v35 = vsel %vm810_vm0, %v784_v23, 0.0  ;;  %2141 = vmatprep.subr.bf16.mxu0 %v3004_v38  ;;  %v824_v52 = vsel %vm810_vm0, %v801_v43, 0.0  ;;  %4291 = vst [vmem:[#allocation8_spill] sm:$0xff] %v3092_v62  ;;  %v3098_v63 = vld [vmem:[%s4184_s2 + $0x88] sm:$0xff]   ;;  %4294 = vst [vmem:[#allocation11_spill] sm:$0xff] %v3110_v1  ;;  %v3122_v5 = vld [vmem:[%s4184_s2 + $0x80] sm:$0xff]  }
   0xd   :  { %2162 = vmatpush3.bf16.msra.mxu1 %v2999_v36  ;;  %4292 = vst [vmem:[#allocation9_spill] sm:$0xff] %v3098_v63  ;;  %4295 = vst [vmem:[#allocation12_spill] sm:$0xff] %v3116_v4  ;;  %v3128_v13 = vld [vmem:[%s4184_s2 + $0x178] sm:$0xff]   ;;  %v152_v14 = vld [vmem:[%s4182_s0] sm:$0xff]  ;;  %v3141_v23 = vsub.s32 %v163_v19, %v2918_v7 }
   0xe   :  { %v815_v37 = vadd.f32 %v814_v29, %v813_v32  ;;  %2163 = vmatprep.subr.bf16.mxu1 %v3017_v42  ;;  %4296 = vst [vmem:[#allocation13_spill] sm:$0xff] %v3122_v5  ;;  %4297 = vst [vmem:[#allocation14_spill] sm:$0xff] %v3128_v13  ;;  %v160_v18 = vcombine.high %v152_v14, %v152_v14  ;;  %v3138_v22 = vld [vmem:[%s4184_s2 + $0x1f8] sm:$0xff]   ;;  %v3171_v43 = vld [vmem:[%s4184_s2 + $0x1f0] sm:$0xff]  }
   0xf   :  { %2142 = vmatpush3.bf16.msra.mxu0 %v3011_v40  ;;  %4298 = vst [vmem:[#allocation15_spill] sm:$0xff] %v3138_v22  ;;  %v167_v24 = vrot.slane %v152_v14, %v3141_v23  ;;  %v3155_v33 = vld [vmem:[%s4184_s2 + $0x138] sm:$0xff]   ;;  %v3213_v9 = vld [vmem:[%s4184_s2 + $0x1a8] sm:$0xff]   ;;  %v3219_v10 = vld [vmem:[%s4184_s2 + $0x1e0] sm:$0xff]  }
  0x10   :  { %v817_v41 = vadd.f32 %v816_v35, %v815_v37  ;;  %2143 = vmatprep.subr.bf16.mxu0 %v3030_v47  ;;  %v3146_v25 = vrot.slane %v160_v18, %v3141_v23  ;;  %v3161_v37 = vld [vmem:[%s4184_s2 + $0x170] sm:$0xff]   ;;  %v3225_v14 = vld [vmem:[%s4184_s2 + $0x120] sm:$0xff]   ;;  %v3231_v18 = vld [vmem:[%s4184_s2 + $0x158] sm:$0xff]  }
  0x11   :  { %2164 = vmatpush3.bf16.msra.mxu1 %v3024_v45  ;;  %v175_v27 = vcombine.high %v167_v24, %v167_v24  ;;  %v183_v28 = vrot.slane %v167_v24, %v3141_v23  ;;  %v3237_v19 = vld [vmem:[%s4184_s2 + $0x1a0] sm:$0xff]   ;;  %v3243_v24 = vld [vmem:[%s4184_s2 + $0x1d8] sm:$0xff]  }
  0x12   :  { %v819_v46 = vadd.f32 %v818_v39, %v817_v41  ;;  %2165 = vmatprep.subr.bf16.mxu1 %v3043_v51  ;;  %v176_v29 = vcombine.high %v3146_v25, %v3146_v25  ;;  %v3166_v41 = vld [vmem:[%s4184_s2 + $0x1b8] sm:$0xff]  }
  0x13   :  { %2144 = vmatpush3.bf16.msra.mxu0 %v3037_v49  ;;  %v197_v32 = vrot.slane %v175_v27, %v3141_v23  ;;  %v205_v35 = vcombine.high %v183_v28, %v183_v28  ;;  %v3249_v27 = vld [vmem:[%s4184_s2 + $0x118] sm:$0xff]  }
  0x14   :  { %v821_v50 = vadd.f32 %v820_v44, %v819_v46  ;;  %2145 = vmatprep.subr.bf16.mxu0 %v3056_v55  ;;  %v204_v34 = vrot.slane %v176_v29, %v3141_v23  ;;  %v3177_v46 = vld [vmem:[%s4184_s2 + $0x130] sm:$0xff]   ;;  %v3261_v29 = vld [vmem:[%s4184_s2 + $0x198] sm:$0xff]  }
  0x15   :  { %2166 = vmatpush3.bf16.msra.mxu1 %v3050_v53  ;;  %633 = vmatprep.mubr.bf16.mxu0 %v197_v32  ;;  %v207_v39 = vcombine.high %v197_v32, %v197_v32  ;;  %4300 = vst [vmem:[#allocation17_spill] sm:$0xff] %v3261_v29  ;;  %v3267_v32 = vld [vmem:[%s4184_s2 + $0x1d0] sm:$0xff]  }
  0x16   :  { %v823_v54 = vadd.f32 %v822_v48, %v821_v50  ;;  %2167 = vmatprep.subr.bf16.mxu1 %v3068_v58  ;;  %v208_v44 = vcombine.high %v204_v34, %v204_v34  ;;  %v3183_v48 = vld [vmem:[%s4184_s2 + $0x168] sm:$0xff]   ;;  %v3189_v50 = vld [vmem:[%s4184_s2 + $0x1b0] sm:$0xff]   ;;  %4301 = vst [vmem:[#allocation18_spill] sm:$0xff] %v3267_v32 }
  0x17   :  { %2146 = vmatpush3.bf16.msra.mxu0 %v3062_v56  ;;  %673 = vmatprep.mubr.bf16.mxu1 %v207_v39  ;;  %v3285_v39 = vld [vmem:[%s4184_s2 + $0x190] sm:$0xff]  }
  0x18   :  { %v825_v57 = vadd.f32 %v824_v52, %v823_v54  ;;  %2147 = vmatprep.subr.bf16.mxu0 %v3080_v60  ;;  %v3195_v52 = vld [vmem:[%s4184_s2 + $0x1e8] sm:$0xff]   ;;  %4304 = vst [vmem:[#allocation21_spill] sm:$0xff] %v3285_v39 }
  0x19   :  { %2168 = vmatpush3.bf16.msra.mxu1 %v3074_v59  ;;  %v3201_v54 = vld [vmem:[%s4184_s2 + $0x128] sm:$0xff]  }
  0x1a   :  { %826 = vadd.xlane.f32.xlu0 %v825_v57  ;;  %2169 = vmatprep.subr.bf16.mxu1 %v3092_v62  ;;  %v3207_v57 = vld [vmem:[%s4184_s2 + $0x160] sm:$0xff]  }
  0x1b   :  { %2148 = vmatpush3.bf16.msra.mxu0 %v3086_v61 }
  0x1c   :  { %2149 = vmatprep.subr.bf16.mxu0 %v3104_v0 }
  0x1d   :  { %2170 = vmatpush3.bf16.msra.mxu1 %v3098_v63 }
  0x1e   :  { %2171 = vmatprep.subr.bf16.mxu1 %v3116_v4 }
  0x1f   :  { %2150 = vmatpush3.bf16.msra.mxu0 %v3110_v1 }
  0x20   :  { %2179 = vmatprep.subr.bf16.mxu0 %v3128_v13 }
  0x21   :  { %2172 = vmatpush3.bf16.msra.mxu1 %v3122_v5 }
  0x22   :  { %2201 = vmatprep.subr.bf16.mxu1 %v3138_v22  ;;  %634 = vmatmul.mubr.bf16.vlgmr.msra.gmra.mxu0 %v183_v28  ;;  %v3255_v28 = vld [vmem:[%s4184_s2 + $0x150] sm:$0xff]  }
  0x23   :  { %2180 = vmatpush3.bf16.msra.mxu0 %v3155_v33  ;;  %713 = vmatprep.mubr.bf16.mxu0 %v204_v34  ;;  %4299 = vst [vmem:[#allocation16_spill] sm:$0xff] %v3255_v28  ;;  %v3273_v34 = vld [vmem:[%s4184_s2 + $0x110] sm:$0xff]  }
  0x24   :  { %674 = vmatmul.mubr.bf16.vlgmr.msra.gmra.mxu1 %v205_v35  ;;  %2181 = vmatprep.subr.bf16.mxu0 %v3161_v37  ;;  %4302 = vst [vmem:[#allocation19_spill] sm:$0xff] %v3273_v34  ;;  %v3279_v35 = vld [vmem:[%s4184_s2 + $0x148] sm:$0xff]  }
  0x25   :  { %2202 = vmatpush3.bf16.msra.mxu1 %v3166_v41  ;;  %753 = vmatprep.mubr.bf16.mxu1 %v208_v44  ;;  %4303 = vst [vmem:[#allocation20_spill] sm:$0xff] %v3279_v35 }
  0x26   :  { %2203 = vmatprep.subr.bf16.mxu1 %v3171_v43 }
  0x27   :  { %2182 = vmatpush3.bf16.msra.mxu0 %v3177_v46 }
  0x28   :  { %2183 = vmatprep.subr.bf16.mxu0 %v3183_v48 }
  0x29   :  { %2204 = vmatpush3.bf16.msra.mxu1 %v3189_v50 }
  0x2a   :  { %2205 = vmatprep.subr.bf16.mxu1 %v3195_v52 }
  0x2b   :  { %2184 = vmatpush3.bf16.msra.mxu0 %v3201_v54 }
  0x2c   :  { %2185 = vmatprep.subr.bf16.mxu0 %v3207_v57 }
  0x2d   :  { %2206 = vmatpush3.bf16.msra.mxu1 %v3213_v9 }
  0x2e   :  { %2207 = vmatprep.subr.bf16.mxu1 %v3219_v10 }
  0x2f   :  { %2186 = vmatpush3.bf16.msra.mxu0 %v3225_v14 }
  0x30   :  { %2187 = vmatprep.subr.bf16.mxu0 %v3231_v18 }
  0x31   :  { %2208 = vmatpush3.bf16.msra.mxu1 %v3237_v19 }
  0x32   :  { %2209 = vmatprep.subr.bf16.mxu1 %v3243_v24 }
  0x33   :  { %2188 = vmatpush3.bf16.msra.mxu0 %v3249_v27 }
  0x34   :  { %2189 = vmatprep.subr.bf16.mxu0 %v3255_v28 }
  0x35   :  { %2210 = vmatpush3.bf16.msra.mxu1 %v3261_v29 }
  0x36   :  { %10 = vsyncpa [#allocation3], 0  ;;  %2211 = vmatprep.subr.bf16.mxu1 %v3267_v32  ;;  %v3291_v44 = vld [vmem:[%s4184_s2 + $0x1c8] sm:$0xff]   ;;  %v3303_v29 = vld [vmem:[%s4184_s2 + $0x140] sm:$0xff]   ;;  %vm1055_vm1 = vcmask 58368   ;;  %vm1069_vm2 = vcmask 64512  }
  0x37   :  { %4305 = vst [vmem:[#allocation22_spill] sm:$0xff] %v3291_v44  ;;  %2190 = vmatpush3.bf16.msra.mxu0 %v3273_v34  ;;  %v3297_v28 = vld [vmem:[%s4184_s2 + $0x108] sm:$0xff]   ;;  %4307 = vst [vmem:[#allocation24_spill] sm:$0xff] %v3303_v29  ;;  %v3315_v34 = vld [vmem:[%s4184_s2 + $0x1c0] sm:$0xff]  }
  0x38   :  { %4306 = vst [vmem:[#allocation23_spill] sm:$0xff] %v3297_v28  ;;  %2191 = vmatprep.subr.bf16.mxu0 %v3279_v35  ;;  %v3309_v32 = vld [vmem:[%s4184_s2 + $0x188] sm:$0xff]   ;;  %4309 = vst [vmem:[#allocation26_spill] sm:$0xff] %v3315_v34  ;;  %v3321_v35 = vld [vmem:[%s4184_s2 + $0x100] sm:$0xff]  }
  0x39   :  { %2212 = vmatpush3.bf16.msra.mxu1 %v3285_v39  ;;  %4308 = vst [vmem:[#allocation25_spill] sm:$0xff] %v3309_v32  ;;  %4310 = vst [vmem:[#allocation27_spill] sm:$0xff] %v3321_v35  ;;  %v190_v39 = vrot.slane %v3146_v25, %v3141_v23 }
  0x3a   :  { %2213 = vmatprep.subr.bf16.mxu1 %v3291_v44  ;;  %v3330_v44 = vld [vmem:[%s4184_s2 + $0x180] sm:$0xff]  }
  0x3b   :  { %2192 = vmatpush3.bf16.msra.mxu0 %v3297_v28  ;;  %4311 = vst [vmem:[#allocation28_spill] sm:$0xff] %v3330_v44  ;;  %v206_v28 = vcombine.high %v190_v39, %v190_v39 }
  0x3c   :  { %2193 = vmatprep.subr.bf16.mxu0 %v3303_v29 }
  0x3d   :  { %2214 = vmatpush3.bf16.msra.mxu1 %v3309_v32 }
  0x3e   :  { %2215 = vmatprep.subr.bf16.mxu1 %v3315_v34 }
  0x3f   :  { %2194 = vmatpush3.bf16.msra.mxu0 %v3321_v35 }
  0x40   :  { %2223 = vmatprep.subr.bf16.mxu0 %v2916_v6 }
  0x41   :  { %2216 = vmatpush3.bf16.msra.mxu1 %v3330_v44 }
  0x42   :  { %714 = vmatmul.mubr.bf16.vlgmr.msra.gmra.mxu0 %v190_v39  ;;  %2245 = vmatprep.subr.bf16.mxu1 %v2931_v11 }
  0x43   :  { %2224 = vmatpush3.bf16.msra.mxu0 %v2923_v8 }
  0x44   :  { %754 = vmatmul.mubr.bf16.vlgmr.msra.gmra.mxu1 %v206_v28  ;;  %2225 = vmatprep.subr.bf16.mxu0 %v2948_v16  ;;  %v2874_v28 = vmov 269488144  }
  0x45   :  { %2246 = vmatpush3.bf16.msra.mxu1 %v2937_v12  ;;  %v832_v39 = vunpack.c.l.s4 %v2874_v28 }
  0x46   :  { %2247 = vmatprep.subr.bf16.mxu1 %v2962_v20 }
  0x47   :  { %2226 = vmatpush3.bf16.msra.mxu0 %v2954_v17 }
  0x48   :  { %2227 = vmatprep.subr.bf16.mxu0 %v2975_v26 }
  0x49   :  { %2248 = vmatpush3.bf16.msra.mxu1 %v2968_v21 }
  0x4a   :  { %2249 = vmatprep.subr.bf16.mxu1 %v2990_v31 }
  0x4b   :  { %2228 = vmatpush3.bf16.msra.mxu0 %v2985_v30 }
  0x4c   :  { %2229 = vmatprep.subr.bf16.mxu0 %v3004_v38 }
  0x4d   :  { %2250 = vmatpush3.bf16.msra.mxu1 %v2999_v36 }
  0x4e   :  { %2251 = vmatprep.subr.bf16.mxu1 %v3017_v42 }
  0x4f   :  { %2230 = vmatpush3.bf16.msra.mxu0 %v3011_v40 }
  0x50   :  { %2231 = vmatprep.subr.bf16.mxu0 %v3030_v47 }
  0x51   :  { %2252 = vmatpush3.bf16.msra.mxu1 %v3024_v45 }
  0x52   :  { %2253 = vmatprep.subr.bf16.mxu1 %v3043_v51 }
  0x53   :  { %2232 = vmatpush3.bf16.msra.mxu0 %v3037_v49 }
  0x54   :  { %2233 = vmatprep.subr.bf16.mxu0 %v3056_v55 }
  0x55   :  { %2254 = vmatpush3.bf16.msra.mxu1 %v3050_v53 }
  0x56   :  { %2255 = vmatprep.subr.bf16.mxu1 %v3068_v58 }
  0x57   :  { %2234 = vmatpush3.bf16.msra.mxu0 %v3062_v56 }
  0x58   :  { %2235 = vmatprep.subr.bf16.mxu0 %v3080_v60 }
  0x59   :  { %2256 = vmatpush3.bf16.msra.mxu1 %v3074_v59 }
  0x5a   :  { %2257 = vmatprep.subr.bf16.mxu1 %v3092_v62 }
  0x5b   :  { %2236 = vmatpush3.bf16.msra.mxu0 %v3086_v61  ;;  %v833_v61 = vunpack.c.0.s8 %v832_v39 }
  0x5c   :  { %2237 = vmatprep.subr.bf16.mxu0 %v3104_v0 }
  0x5d   :  { %2258 = vmatpush3.bf16.msra.mxu1 %v3098_v63  ;;  %v836_v0 = vsub.s32 %v833_v61, %v2918_v7 }
  0x5e   :  { %2259 = vmatprep.subr.bf16.mxu1 %v3116_v4 }
  0x5f   :  { %2238 = vmatpush3.bf16.msra.mxu0 %v3110_v1 }
  0x60   :  { %2267 = vmatprep.subr.bf16.mxu0 %v3128_v13 }
  0x61   :  { %2260 = vmatpush3.bf16.msra.mxu1 %v3122_v5 }
  0x62   :  { %2289 = vmatprep.subr.bf16.mxu1 %v3138_v22 }
  0xa3   :  { %v827_v23 = vpop.xlane.xlu0 %826 }
  0xa4   :  { %v828_v25 = vadd.f32 1e-16, %v827_v23 }
  0xa6   :  { %2764 = vrsqrt.f32 %v828_v25 }
  0xb3   :  { %v2765_v62 = vpop.eup %2764 }
  0xb4   :  { %v837_v63 = vrot.slane %v2765_v62, %v836_v0 }
  0xb6   :  { %v839_v4 = vmul.f32 %v837_v63, %v2909_v2  ;;  %v840_v1 = vmul.f32 %v837_v63, %v2911_v3 }
  0xb8   :  { %v850_v13 = vrot.slane %v839_v4, %v2942_v15  ;;  %v843_v60 = vcombine.high %v839_v4, %v839_v4  ;;  %v867_v5 = vrot.slane %v840_v1, %v2942_v15  ;;  %v860_v22 = vcombine.high %v840_v1, %v840_v1  ;;  %v4315_v1 = vld [vmem:[#allocation19_spill] sm:$0xff]  ;;  %v4316_v4 = vld [vmem:[#allocation20_spill] sm:$0xff] }
  0xba   :  { %v858_v59 = vcombine.high %v850_v13, %v850_v13  ;;  %v857_v23 = vrot.slane %v843_v60, %v2942_v15  ;;  %v875_v25 = vcombine.high %v867_v5, %v867_v5  ;;  %v874_v28 = vrot.slane %v860_v22, %v2942_v15  ;;  %v4312_v15 = vld [vmem:[#allocation16_spill] sm:$0xff]  ;;  %v4314_v60 = vld [vmem:[#allocation18_spill] sm:$0xff] }
  0xbb   :  { %v885_v61 = vpack.c.bf16 %v850_v13, %v850_v13  ;;  %v4317_v13 = vld [vmem:[#allocation21_spill] sm:$0xff]  ;;  %v4318_v22 = vld [vmem:[#allocation22_spill] sm:$0xff] }
  0xbc   :  { %v886_v39 = vpack.c.bf16 %v858_v59, %v858_v59  ;;  %v859_v7 = vcombine.high %v857_v23, %v857_v23  ;;  %v876_v62 = vcombine.high %v874_v28, %v874_v28  ;;  %v890_v3 = vpack.c.bf16 %v875_v25, %v875_v25  ;;  %v4313_v59 = vld [vmem:[#allocation17_spill] sm:$0xff] }
  0xbd   :  { %v887_v63 = vpack.c.bf16 %v857_v23, %v857_v23  ;;  %v4319_v23 = vld [vmem:[#allocation23_spill] sm:$0xff]  ;;  %v889_v25 = vpack.c.bf16 %v867_v5, %v867_v5 }
  0xbe   :  { %925 = vmatprep.mubr.bf16.mxu0 %v886_v39  ;;  %v888_v2 = vpack.c.bf16 %v859_v7, %v859_v7  ;;  %v892_v0 = vpack.c.bf16 %v876_v62, %v876_v62  ;;  %v891_v39 = vpack.c.bf16 %v874_v28, %v874_v28 }
  0xbf   :  { %926 = vmatmul.mubr.bf16.vlgmr.msra.gmra.mxu0 %v885_v61  ;;  %v2062_v61 = vld [vmem:[%s4185_s3] ss:$0 sm:$0xff] }
  0xc0   :  { %2268 = vmatpush3.bf16.msra.mxu0 %v3155_v33  ;;  %965 = vmatprep.mubr.bf16.mxu1 %v888_v2 }
  0xc1   :  { %1005 = vmatprep.mubr.bf16.mxu0 %v890_v3  ;;  %966 = vmatmul.mubr.bf16.vlgmr.msra.gmra.mxu1 %v887_v63 }
  0xc2   :  { %2290 = vmatpush3.bf16.msra.mxu1 %v3166_v41  ;;  %2269 = vmatprep.subr.bf16.mxu0 %v3161_v37 }
  0xc3   :  { %1045 = vmatprep.mubr.bf16.mxu1 %v892_v0  ;;  %2291 = vmatprep.subr.bf16.mxu1 %v3171_v43 }
  0xc4   :  { %2270 = vmatpush3.bf16.msra.mxu0 %v3177_v46 }
  0xc5   :  { %2271 = vmatprep.subr.bf16.mxu0 %v3183_v48 }
  0xc6   :  { %2292 = vmatpush3.bf16.msra.mxu1 %v3189_v50 }
  0xc7   :  { %2293 = vmatprep.subr.bf16.mxu1 %v3195_v52 }
  0xc8   :  { %2272 = vmatpush3.bf16.msra.mxu0 %v3201_v54 }
  0xc9   :  { %2273 = vmatprep.subr.bf16.mxu0 %v3207_v57 }
  0xca   :  { %2294 = vmatpush3.bf16.msra.mxu1 %v3213_v9 }
  0xcb   :  { %2295 = vmatprep.subr.bf16.mxu1 %v3219_v10 }
  0xcc   :  { %2274 = vmatpush3.bf16.msra.mxu0 %v3225_v14 }
  0xcd   :  { %2275 = vmatprep.subr.bf16.mxu0 %v3231_v18 }
  0xce   :  { %2296 = vmatpush3.bf16.msra.mxu1 %v3237_v19 }
  0xcf   :  { %2297 = vmatprep.subr.bf16.mxu1 %v3243_v24 }
  0xd0   :  { %2276 = vmatpush3.bf16.msra.mxu0 %v3249_v27 }
  0xd1   :  { %2277 = vmatprep.subr.bf16.mxu0 %v4312_v15 }
  0xd2   :  { %2298 = vmatpush3.bf16.msra.mxu1 %v4313_v59 }
  0xd3   :  { %2299 = vmatprep.subr.bf16.mxu1 %v4314_v60 }
  0xd4   :  { %2278 = vmatpush3.bf16.msra.mxu0 %v4315_v1 }
  0xd5   :  { %2279 = vmatprep.subr.bf16.mxu0 %v4316_v4 }
  0xd6   :  { %2300 = vmatpush3.bf16.msra.mxu1 %v4317_v13 }
  0xd7   :  { %2301 = vmatprep.subr.bf16.mxu1 %v4318_v22 }
  0xd8   :  { %2280 = vmatpush3.bf16.msra.mxu0 %v4319_v23 }
  0xd9   :  { %2281 = vmatprep.subr.bf16.mxu0 %v3303_v29 }
  0xda   :  { %2302 = vmatpush3.bf16.msra.mxu1 %v3309_v32 }
  0xdb   :  { %2303 = vmatprep.subr.bf16.mxu1 %v3315_v34 }
  0xdc   :  { %2282 = vmatpush3.bf16.msra.mxu0 %v3321_v35 }
  0xdd   :  { %2631 = vmatprep.subr.msk.bf16.mxu0 %vm1069_vm2, %v2916_v6  ;;  %v3433_v6 = vsel %vm1069_vm2, %v2954_v17, 0  ;;  %v3465_v17 = vsel %vm1069_vm2, %v3024_v45, 0 }
  0xde   :  { %2304 = vmatpush3.bf16.msra.mxu1 %v3330_v44  ;;  %4321 = vst [vmem:[#allocation30_spill] sm:$0xff] %v3433_v6  ;;  %4326 = vst [vmem:[#allocation35_spill] sm:$0xff] %v3465_v17 }
  0xdf   :  { %1006 = vmatmul.mubr.bf16.vlgmr.msra.gmra.mxu0 %v889_v25  ;;  %2639 = vmatprep.subr.msk.bf16.mxu1 %vm1069_vm2, %v2931_v11  ;;  %v3447_v11 = vsel %vm1069_vm2, %v2985_v30, 0  ;;  %v4330_v30 = vld [vmem:[#allocation5_spill] sm:$0xff] }
  0xe0   :  { %4323 = vst [vmem:[#allocation32_spill] sm:$0xff] %v3447_v11 }
  0xe1   :  { %1046 = vmatmul.mubr.bf16.vlgmr.msra.gmra.mxu1 %v891_v39 }
  0xe2   :  { %v2151_v7 = vpop.f32.mrf.mxu0 }
  0xe4   :  { %v2152_v62 = vpop.f32.mrf.mxu0  ;;  %v2173_v2 = vpop.f32.mrf.mxu1 }
  0xe5   :  { %v2153_v3 = vadd.f32 %v2152_v62, %v2151_v7 }
  0xe6   :  { %v2154_v63 = vpop.f32.mrf.mxu0  ;;  %v2174_v0 = vpop.f32.mrf.mxu1 }
  0xe7   :  { %v636_v29 = vadd.f32 %v2153_v3, %v2062_v61  ;;  %v2175_v34 = vadd.f32 %v2174_v0, %v2173_v2 }
  0xe8   :  { %v2155_v32 = vpop.f32.mrf.mxu0  ;;  %v2176_v35 = vpop.f32.mrf.mxu1 }
  0xe9   :  { %v676_v5 = vadd.f32 %v2175_v34, %v636_v29 }
  0xea   :  { %v2177_v23 = vpop.f32.mrf.mxu1 }
 0x102   :  { %v2195_v44 = vpop.f32.mrf.mxu0 }
 0x104   :  { %v2196_v25 = vpop.f32.mrf.mxu0  ;;  %v2217_v28 = vpop.f32.mrf.mxu1 }
 0x105   :  { %v2197_v39 = vadd.f32 %v2196_v25, %v2195_v44 }
 0x106   :  { %v2218_v22 = vpop.f32.mrf.mxu1  ;;  %v2198_v4 = vpop.f32.mrf.mxu0 }
 0x107   :  { %v716_v13 = vadd.f32 %v2197_v39, %v676_v5  ;;  %v2219_v1 = vadd.f32 %v2218_v22, %v2217_v28 }
 0x108   :  { %v2199_v60 = vpop.f32.mrf.mxu0  ;;  %v2220_v15 = vpop.f32.mrf.mxu1 }
 0x109   :  { %v3409_v59 = vadd.f32 %v2219_v1, %v716_v13 }
 0x10a   :  { %v2221_v7 = vpop.f32.mrf.mxu1 }
 0x10b   :  { %4320 = vst [vmem:[#allocation29_spill] sm:$0xff] %v3409_v59 }
 0x17f   :  { %v2239_v62 = vpop.f32.mrf.mxu0 }
 0x181   :  { %v2240_v61 = vpop.f32.mrf.mxu0  ;;  %v2261_v2 = vpop.f32.mrf.mxu1 }
 0x182   :  { %v2241_v44 = vadd.f32 %v2240_v61, %v2239_v62  ;;  %v3419_v62 = vsel %vm1069_vm2, %v2923_v8, 0  ;;  %v3423_v61 = vsel %vm1069_vm2, %v2937_v12, 0  ;;  %v3437_v8 = vsel %vm1069_vm2, %v2968_v21, 0 }
 0x183   :  { %v2242_v32 = vpop.f32.mrf.mxu0  ;;  %v2262_v35 = vpop.f32.mrf.mxu1  ;;  %2312 = vmatpush3.bf16.xpose.msra.mxu0 %v3419_v62  ;;  %2330 = vmatpush3.bf16.xpose.msra.mxu1 %v3423_v61  ;;  %4322 = vst [vmem:[#allocation31_spill] sm:$0xff] %v3437_v8  ;;  %v3451_v12 = vsel %vm1069_vm2, %v2999_v36, 0  ;;  %v3479_v21 = vsel %vm1069_vm2, %v3050_v53, 0  ;;  %v4332_v36 = vld [vmem:[#allocation6_spill] sm:$0xff] }
 0x184   :  { %v2263_v3 = vadd.f32 %v2262_v35, %v2261_v2  ;;  %2632 = vmatprep.subr.msk.bf16.mxu0 %vm1069_vm2, %v2948_v16  ;;  %2640 = vmatprep.subr.msk.bf16.mxu1 %vm1069_vm2, %v2962_v20  ;;  %4324 = vst [vmem:[#allocation33_spill] sm:$0xff] %v3451_v12  ;;  %v3461_v16 = vsel %vm1069_vm2, %v3011_v40, 0  ;;  %v3475_v20 = vsel %vm1069_vm2, %v3037_v49, 0  ;;  %4328 = vst [vmem:[#allocation37_spill] sm:$0xff] %v3479_v21 }
 0x185   :  { %v2243_v29 = vpop.f32.mrf.mxu0  ;;  %v2264_v34 = vpop.f32.mrf.mxu1  ;;  %4325 = vst [vmem:[#allocation34_spill] sm:$0xff] %v3461_v16  ;;  %4327 = vst [vmem:[#allocation36_spill] sm:$0xff] %v3475_v20 }
 0x186   :  { %v968_v5 = vadd.f32 %v2263_v3, %v2241_v44  ;;  %v4334_v34 = vld [vmem:[#allocation7_spill] sm:$0xff]  ;;  %v4336_v3 = vld [vmem:[#allocation9_spill] sm:$0xff]  ;;  %v4338_v44 = vld [vmem:[#allocation10_spill] sm:$0xff] }
 0x187   :  { %v2265_v23 = vpop.f32.mrf.mxu1 }
 0x188   :  { %v3504_v23 = vsel %vm1069_vm2, %v4334_v34, 0 }
 0x189   :  { %4335 = vst [vmem:[#allocation6_spill] sm:$0xff] %v3504_v23 }
 0x18b   :  { %2314 = vmatpush3.bf16.xpose.msra.mxu0 %v3433_v6  ;;  %2332 = vmatpush3.bf16.xpose.msra.mxu1 %v3437_v8 }
 0x18c   :  { %2633 = vmatprep.subr.msk.bf16.mxu0 %vm1069_vm2, %v2975_v26  ;;  %2641 = vmatprep.subr.msk.bf16.mxu1 %vm1069_vm2, %v2990_v31  ;;  %v3489_v26 = vsel %vm1069_vm2, %v3062_v56, 0  ;;  %v3493_v31 = vsel %vm1069_vm2, %v4330_v30, 0 }
 0x18d   :  { %4329 = vst [vmem:[#allocation38_spill] sm:$0xff] %v3489_v26  ;;  %4331 = vst [vmem:[#allocation5_spill] sm:$0xff] %v3493_v31 }
 0x193   :  { %2316 = vmatpush3.bf16.xpose.msra.mxu0 %v3447_v11  ;;  %2334 = vmatpush3.bf16.xpose.msra.mxu1 %v3451_v12 }
 0x194   :  { %2634 = vmatprep.subr.msk.bf16.mxu0 %vm1069_vm2, %v3004_v38  ;;  %2642 = vmatprep.subr.msk.bf16.mxu1 %vm1069_vm2, %v3017_v42  ;;  %v4333_v38 = vld [vmem:[#allocation8_spill] sm:$0xff] }
 0x19b   :  { %2318 = vmatpush3.bf16.xpose.msra.mxu0 %v3461_v16  ;;  %2336 = vmatpush3.bf16.xpose.msra.mxu1 %v3465_v17  ;;  %v3733_v17 = vld [vmem:[%s4184_s2 + $0xe0] sm:$0xff]   ;;  %v3751_v16 = vld [vmem:[%s4184_s2 + $0x58] sm:$0xff]  }
 0x19c   :  { %2635 = vmatprep.subr.msk.bf16.mxu0 %vm1069_vm2, %v3030_v47  ;;  %2643 = vmatprep.subr.msk.bf16.mxu1 %vm1069_vm2, %v3043_v51  ;;  %4385 = vst [vmem:[#allocation46_spill] sm:$0xff] %v3733_v17  ;;  %4388 = vst [vmem:[#allocation49_spill] sm:$0xff] %v3751_v16 }
 0x19f   :  { %v2283_v63 = vpop.f32.mrf.mxu0 }
 0x1a1   :  { %v2284_v0 = vpop.f32.mrf.mxu0  ;;  %v2305_v4 = vpop.f32.mrf.mxu1 }
 0x1a2   :  { %v2285_v22 = vadd.f32 %v2284_v0, %v2283_v63  ;;  %v3508_v63 = vsel %vm1069_vm2, %v4336_v3, 0  ;;  %v4339_v0 = vld [vmem:[#allocation12_spill] sm:$0xff] }
 0x1a3   :  { %v2286_v60 = vpop.f32.mrf.mxu0  ;;  %v2306_v15 = vpop.f32.mrf.mxu1  ;;  %2320 = vmatpush3.bf16.xpose.msra.mxu0 %v3475_v20  ;;  %2338 = vmatpush3.bf16.xpose.msra.mxu1 %v3479_v21  ;;  %4337 = vst [vmem:[#allocation8_spill] sm:$0xff] %v3508_v63  ;;  %v3709_v21 = vld [vmem:[%s4184_s2 + $0xe8] sm:$0xff]   ;;  %v3727_v20 = vld [vmem:[%s4184_s2 + $0x60] sm:$0xff]  }
 0x1a4   :  { %v1008_v1 = vadd.f32 %v2285_v22, %v968_v5  ;;  %v2307_v13 = vadd.f32 %v2306_v15, %v2305_v4  ;;  %2636 = vmatprep.subr.msk.bf16.mxu0 %vm1069_vm2, %v3056_v55  ;;  %2644 = vmatprep.subr.msk.bf16.mxu1 %vm1069_vm2, %v3068_v58  ;;  %v4340_v4 = vld [vmem:[#allocation11_spill] sm:$0xff]  ;;  %v4342_v22 = vld [vmem:[#allocation13_spill] sm:$0xff]  ;;  %v4344_v15 = vld [vmem:[#allocation14_spill] sm:$0xff]  ;;  %4384 = vst [vmem:[#allocation45_spill] sm:$0xff] %v3727_v20 }
 0x1a5   :  { %v2287_v25 = vpop.f32.mrf.mxu0  ;;  %v2308_v28 = vpop.f32.mrf.mxu1  ;;  %v3518_v5 = vsel %vm1069_vm2, %v4340_v4, 0  ;;  %v3522_v60 = vsel %vm1069_vm2, %v4342_v22, 0 }
 0x1a6   :  { %v1048_v39 = vadd.f32 %v2307_v13, %v1008_v1  ;;  %4341 = vst [vmem:[#allocation7_spill] sm:$0xff] %v3518_v5  ;;  %4343 = vst [vmem:[#allocation9_spill] sm:$0xff] %v3522_v60  ;;  %v4345_v1 = vld [vmem:[#allocation15_spill] sm:$0xff]  ;;  %v3533_v28 = vld [vmem:[%s4186_s4] sm:$0x3] }
 0x1a7   :  { %v2309_v7 = vpop.f32.mrf.mxu1  ;;  %4346 = vst [vmem:[#allocation10_spill] sm:$0xff] %v3533_v28 }
 0x1a8   :  { %v1053_v32 = vmul.f32 10.0, %v1048_v39 }
 0x1aa   :  { %v1054_v29 = vadd.f32 %v1053_v32, %v3409_v59 }
 0x1ab   :  { %2322 = vmatpush3.bf16.xpose.msra.mxu0 %v3489_v26  ;;  %2340 = vmatpush3.bf16.xpose.msra.mxu1 %v3493_v31  ;;  %v3679_v31 = vld [vmem:[%s4184_s2 + $0x70] sm:$0xff]   ;;  %v3703_v26 = vld [vmem:[%s4184_s2 + $0x68] sm:$0xff]  }
 0x1ac   :  { %v1056_v2 = vsel %vm1055_vm1, %v1054_v29, -inf  ;;  %2637 = vmatprep.subr.msk.bf16.mxu0 %vm1069_vm2, %v4332_v36  ;;  %2645 = vmatprep.subr.msk.bf16.mxu1 %vm1069_vm2, %v4333_v38 }
 0x1ad   :  { %1057 = vmax.xlane.f32.xlu0 %v1056_v2  ;;  %v3542_v2 = vsel %vm1069_vm2, %v3166_v41, 0 }
 0x1ae   :  { %4348 = vst [vmem:[#allocation11_spill] sm:$0xff] %v3542_v2 }
 0x1b3   :  { %2324 = vmatpush3.bf16.xpose.msra.mxu0 %v3504_v23  ;;  %2342 = vmatpush3.bf16.xpose.msra.mxu1 %v3508_v63  ;;  %v4374_v63 = vld [vmem:[#allocation28_spill] sm:$0xff] }
 0x1b4   :  { %2638 = vmatprep.subr.msk.bf16.mxu0 %vm1069_vm2, %v4338_v44  ;;  %2646 = vmatprep.subr.msk.bf16.mxu1 %vm1069_vm2, %v4339_v0  ;;  %v3646_v23 = vsel %vm1069_vm2, %v4374_v63, 0  ;;  %4381 = vst [vmem:[#allocation28_spill] sm:$0xff] %v3709_v21 }
 0x1bb   :  { %2326 = vmatpush3.bf16.xpose.msra.mxu0 %v3518_v5  ;;  %2344 = vmatpush3.bf16.xpose.msra.mxu1 %v3522_v60  ;;  %v4372_v60 = vld [vmem:[#allocation27_spill] sm:$0xff] }
 0x1bc   :  { %2647 = vmatprep.subr.msk.bf16.mxu0 %vm1069_vm2, %v4344_v15  ;;  %2655 = vmatprep.subr.msk.bf16.mxu1 %vm1069_vm2, %v4345_v1  ;;  %v3642_v5 = vsel %vm1069_vm2, %v4372_v60, 0  ;;  %4380 = vst [vmem:[#allocation27_spill] sm:$0xff] %v3703_v26 }
 0x236   :  { %v1058_v40 = vpop.xlane.xlu0 %1057 }
 0x237   :  { %v1059_v42 = vsub.f32 %v1054_v29, %v1058_v40  ;;  %v3538_v29 = vsel %vm1069_vm2, %v3155_v33, 0  ;;  %v3558_v40 = vsel %vm1069_vm2, %v3177_v46, 0 }
 0x238   :  { %4347 = vst [vmem:[#allocation12_spill] sm:$0xff] %v3538_v29  ;;  %4349 = vst [vmem:[#allocation13_spill] sm:$0xff] %v3558_v40 }
 0x239   :  { %v1060_v45 = vmul.f32 1.442695, %v1059_v42  ;;  %v3562_v42 = vsel %vm1069_vm2, %v3189_v50, 0 }
 0x23a   :  { %4350 = vst [vmem:[#allocation14_spill] sm:$0xff] %v3562_v42 }
 0x23b   :  { %2766 = vpow2.f32 %v1060_v45  ;;  %v3572_v45 = vsel %vm1069_vm2, %v3201_v54, 0 }
 0x23c   :  { %4351 = vst [vmem:[#allocation15_spill] sm:$0xff] %v3572_v45 }
 0x248   :  { %v2767_v47 = vpop.eup %2766 }
 0x249   :  { %v1062_v35 = vsel %vm1055_vm1, %v2767_v47, 0.0 }
 0x24a   :  { %1063 = vadd.xlane.f32.xlu1 %v1062_v35  ;;  %v3586_v35 = vsel %vm1069_vm2, %v3225_v14, 0 }
 0x24b   :  { %4353 = vst [vmem:[#allocation40_spill] sm:$0xff] %v3586_v35 }
 0x2d3   :  { %v1064_v13 = vpop.xlane.xlu1 %1063 }
 0x2d4   :  { %2768 = vrcp.f32 %v1064_v13  ;;  %v3590_v13 = vsel %vm1069_vm2, %v3237_v19, 0 }
 0x2d5   :  { %4354 = vst [vmem:[#allocation41_spill] sm:$0xff] %v3590_v13 }
 0x2e1   :  { %v2769_v25 = vpop.eup %2768 }
 0x2e2   :  { %v1066_v39 = vmul.f32 %v2769_v25, %v2767_v47  ;;  %v3576_v47 = vsel %vm1069_vm2, %v3213_v9, 0  ;;  %v3600_v25 = vsel %vm1069_vm2, %v3249_v27, 0 }
 0x2e3   :  { %4352 = vst [vmem:[#allocation39_spill] sm:$0xff] %v3576_v47  ;;  %4355 = vst [vmem:[#allocation42_spill] sm:$0xff] %v3600_v25 }
 0x2e4   :  { %v1067_v7 = vsub.f32 %v1066_v39, %v3533_v28  ;;  %v4356_v39 = vld [vmem:[#allocation17_spill] sm:$0xff] }
 0x2e5   :  { %v4368_v28 = vld [vmem:[#allocation25_spill] sm:$0xff] }
 0x2e6   :  { %v1068_v32 = vpack.c.bf16 %v1067_v7, %v1067_v7  ;;  %v3604_v7 = vsel %vm1069_vm2, %v4356_v39, 0  ;;  %v3632_v59 = vsel %vm1069_vm2, %v4368_v28, 0 }
 0x2e7   :  { %4357 = vst [vmem:[#allocation17_spill] sm:$0xff] %v3604_v7 }
 0x2e8   :  { %2327 = vmatprep.mubr.msk.bf16.mxu0 %vm1069_vm2, %v1068_v32  ;;  %2345 = vmatprep.mubr.msk.bf16.mxu1 %vm1069_vm2, %v1068_v32 }
 0x2e9   :  { %2328 = vmatmul.mubr.msk.bf16.vlgmr.msra.gmra.mxu0 %vm1069_vm2, %v1068_v32  ;;  %2346 = vmatmul.mubr.msk.bf16.vlgmr.msra.gmra.mxu1 %vm1069_vm2, %v1068_v32 }
 0x2ea   :  { %2348 = vmatpush3.bf16.xpose.msra.mxu0 %v3538_v29  ;;  %2366 = vmatpush3.bf16.xpose.msra.mxu1 %v3542_v2  ;;  %v4366_v2 = vld [vmem:[#allocation23_spill] sm:$0xff] }
 0x2eb   :  { %2363 = vmatprep.mubr.msk.bf16.mxu0 %vm1069_vm2, %v1068_v32  ;;  %2381 = vmatprep.mubr.msk.bf16.mxu1 %vm1069_vm2, %v1068_v32  ;;  %v3628_v29 = vsel %vm1069_vm2, %v4366_v2, 0 }
 0x2ec   :  { %2648 = vmatprep.subr.msk.bf16.mxu0 %vm1069_vm2, %v3161_v37  ;;  %2656 = vmatprep.subr.msk.bf16.mxu1 %vm1069_vm2, %v3171_v43 }
 0x2f2   :  { %2350 = vmatpush3.bf16.xpose.msra.mxu0 %v3558_v40  ;;  %2368 = vmatpush3.bf16.xpose.msra.mxu1 %v3562_v42  ;;  %v4362_v42 = vld [vmem:[#allocation21_spill] sm:$0xff] }
 0x2f3   :  { %2649 = vmatprep.subr.msk.bf16.mxu0 %vm1069_vm2, %v3183_v48  ;;  %2657 = vmatprep.subr.msk.bf16.mxu1 %vm1069_vm2, %v3195_v52  ;;  %v3618_v40 = vsel %vm1069_vm2, %v4362_v42, 0  ;;  %4369 = vst [vmem:[#allocation21_spill] sm:$0xff] %v3632_v59 }
 0x2fa   :  { %2352 = vmatpush3.bf16.xpose.msra.mxu0 %v3572_v45  ;;  %2370 = vmatpush3.bf16.xpose.msra.mxu1 %v3576_v47  ;;  %v4360_v47 = vld [vmem:[#allocation19_spill] sm:$0xff] }
 0x2fb   :  { %2650 = vmatprep.subr.msk.bf16.mxu0 %vm1069_vm2, %v3207_v57  ;;  %2658 = vmatprep.subr.msk.bf16.mxu1 %vm1069_vm2, %v3219_v10  ;;  %v3614_v45 = vsel %vm1069_vm2, %v4360_v47, 0  ;;  %4367 = vst [vmem:[#allocation19_spill] sm:$0xff] %v3628_v29 }
 0x302   :  { %2354 = vmatpush3.bf16.xpose.msra.mxu0 %v3586_v35  ;;  %2372 = vmatpush3.bf16.xpose.msra.mxu1 %v3590_v13  ;;  %v4358_v35 = vld [vmem:[#allocation16_spill] sm:$0xff]  ;;  %v4359_v13 = vld [vmem:[#allocation18_spill] sm:$0xff] }
 0x303   :  { %2651 = vmatprep.subr.msk.bf16.mxu0 %vm1069_vm2, %v3231_v18  ;;  %2659 = vmatprep.subr.msk.bf16.mxu1 %vm1069_vm2, %v3243_v24  ;;  %4361 = vst [vmem:[#allocation16_spill] sm:$0xff] %v3614_v45  ;;  %4363 = vst [vmem:[#allocation18_spill] sm:$0xff] %v3618_v40 }
 0x30a   :  { %2356 = vmatpush3.bf16.xpose.msra.mxu0 %v3600_v25  ;;  %2374 = vmatpush3.bf16.xpose.msra.mxu1 %v3604_v7  ;;  %v4364_v25 = vld [vmem:[#allocation20_spill] sm:$0xff]  ;;  %v4365_v7 = vld [vmem:[#allocation22_spill] sm:$0xff] }
 0x30b   :  { %2652 = vmatprep.subr.msk.bf16.mxu0 %vm1069_vm2, %v4358_v35  ;;  %2660 = vmatprep.subr.msk.bf16.mxu1 %vm1069_vm2, %v4359_v13  ;;  %4373 = vst [vmem:[#allocation20_spill] sm:$0xff] %v3642_v5  ;;  %4375 = vst [vmem:[#allocation22_spill] sm:$0xff] %v3646_v23 }
 0x312   :  { %2358 = vmatpush3.bf16.xpose.msra.mxu0 %v3614_v45  ;;  %2376 = vmatpush3.bf16.xpose.msra.mxu1 %v3618_v40  ;;  %v4370_v45 = vld [vmem:[#allocation24_spill] sm:$0xff]  ;;  %v4371_v40 = vld [vmem:[#allocation26_spill] sm:$0xff] }
 0x313   :  { %2653 = vmatprep.subr.msk.bf16.mxu0 %vm1069_vm2, %v4364_v25  ;;  %2661 = vmatprep.subr.msk.bf16.mxu1 %vm1069_vm2, %v4365_v7 }
 0x31a   :  { %2360 = vmatpush3.bf16.xpose.msra.mxu0 %v3628_v29  ;;  %2378 = vmatpush3.bf16.xpose.msra.mxu1 %v3632_v59  ;;  %v3653_v59 = vld [vmem:[%s4184_s2 + $0x78] sm:$0xff]  }
 0x31b   :  { %2654 = vmatprep.subr.msk.bf16.mxu0 %vm1069_vm2, %v4370_v45  ;;  %2662 = vmatprep.subr.msk.bf16.mxu1 %vm1069_vm2, %v4371_v40  ;;  %v3659_v29 = vld [vmem:[%s4184_s2 + $0xf8] sm:$0xff]  }
 0x322   :  { %2362 = vmatpush3.bf16.xpose.msra.mxu0 %v3642_v5  ;;  %2380 = vmatpush3.bf16.xpose.msra.mxu1 %v3646_v23  ;;  %v3667_v23 = vld [vmem:[%s4184_s2 + $0x38] sm:$0xff]  }
 0x323   :  { %2383 = vmatprep.subr.bf16.mxu0 %v3653_v59  ;;  %2405 = vmatprep.subr.bf16.mxu1 %v3659_v29  ;;  %4376 = vst [vmem:[#allocation23_spill] sm:$0xff] %v3667_v23  ;;  %v3673_v5 = vld [vmem:[%s4184_s2 + $0xb8] sm:$0xff]  }
 0x324   :  { %4377 = vst [vmem:[#allocation25_spill] sm:$0xff] %v3673_v5 }
 0x329   :  { %2364 = vmatmul.mubr.msk.bf16.vlgmr.msra.gmra.mxu0 %vm1069_vm2, %v1068_v32  ;;  %2382 = vmatmul.mubr.msk.bf16.vlgmr.msra.gmra.mxu1 %vm1069_vm2, %v1068_v32  ;;  %v3685_v32 = vld [vmem:[%s4184_s2 + $0xf0] sm:$0xff]  }
 0x32a   :  { %2384 = vmatpush3.bf16.msra.mxu0 %v3667_v23  ;;  %2406 = vmatpush3.bf16.msra.mxu1 %v3673_v5  ;;  %v3691_v23 = vld [vmem:[%s4184_s2 + $0x30] sm:$0xff]  }
 0x32b   :  { %2385 = vmatprep.subr.bf16.mxu0 %v3679_v31  ;;  %2407 = vmatprep.subr.bf16.mxu1 %v3685_v32  ;;  %4378 = vst [vmem:[#allocation24_spill] sm:$0xff] %v3691_v23  ;;  %v3697_v5 = vld [vmem:[%s4184_s2 + $0xb0] sm:$0xff]  }
 0x32c   :  { %4379 = vst [vmem:[#allocation26_spill] sm:$0xff] %v3697_v5 }
 0x32e   :  { %2386 = vmatpush3.bf16.msra.mxu0 %v3691_v23  ;;  %2408 = vmatpush3.bf16.msra.mxu1 %v3697_v5  ;;  %v3715_v23 = vld [vmem:[%s4184_s2 + $0x28] sm:$0xff]  }
 0x32f   :  { %2387 = vmatprep.subr.bf16.mxu0 %v3703_v26  ;;  %2409 = vmatprep.subr.bf16.mxu1 %v3709_v21  ;;  %4382 = vst [vmem:[#allocation43_spill] sm:$0xff] %v3715_v23  ;;  %v3721_v5 = vld [vmem:[%s4184_s2 + $0xa8] sm:$0xff]  }
 0x330   :  { %4383 = vst [vmem:[#allocation44_spill] sm:$0xff] %v3721_v5 }
 0x332   :  { %2388 = vmatpush3.bf16.msra.mxu0 %v3715_v23  ;;  %2410 = vmatpush3.bf16.msra.mxu1 %v3721_v5  ;;  %v3739_v23 = vld [vmem:[%s4184_s2 + $0x20] sm:$0xff]  }
 0x333   :  { %2389 = vmatprep.subr.bf16.mxu0 %v3727_v20  ;;  %2411 = vmatprep.subr.bf16.mxu1 %v3733_v17  ;;  %4386 = vst [vmem:[#allocation47_spill] sm:$0xff] %v3739_v23  ;;  %v3745_v5 = vld [vmem:[%s4184_s2 + $0xa0] sm:$0xff]  }
 0x334   :  { %4387 = vst [vmem:[#allocation48_spill] sm:$0xff] %v3745_v5 }
 0x336   :  { %2390 = vmatpush3.bf16.msra.mxu0 %v3739_v23  ;;  %2412 = vmatpush3.bf16.msra.mxu1 %v3745_v5 }
 0x337   :  { %2391 = vmatprep.subr.bf16.mxu0 %v3751_v16  ;;  %2413 = vmatprep.subr.bf16.mxu1 %v3043_v51 }
 0x33a   :  { %2392 = vmatpush3.bf16.msra.mxu0 %v3037_v49  ;;  %2414 = vmatpush3.bf16.msra.mxu1 %v3050_v53 }
 0x33b   :  { %2393 = vmatprep.subr.bf16.mxu0 %v3056_v55  ;;  %2415 = vmatprep.subr.bf16.mxu1 %v3068_v58 }
 0x33e   :  { %2394 = vmatpush3.bf16.msra.mxu0 %v3062_v56  ;;  %2416 = vmatpush3.bf16.msra.mxu1 %v4330_v30 }
 0x33f   :  { %2395 = vmatprep.subr.bf16.mxu0 %v4332_v36  ;;  %2417 = vmatprep.subr.bf16.mxu1 %v4333_v38 }
 0x342   :  { %2396 = vmatpush3.bf16.msra.mxu0 %v4334_v34  ;;  %2418 = vmatpush3.bf16.msra.mxu1 %v4336_v3 }
 0x343   :  { %2397 = vmatprep.subr.bf16.mxu0 %v4338_v44  ;;  %2419 = vmatprep.subr.bf16.mxu1 %v4339_v0 }
 0x346   :  { %2398 = vmatpush3.bf16.msra.mxu0 %v4340_v4  ;;  %2420 = vmatpush3.bf16.msra.mxu1 %v4342_v22 }
 0x347   :  { %2427 = vmatprep.subr.bf16.mxu0 %v4344_v15  ;;  %2449 = vmatprep.subr.bf16.mxu1 %v4345_v1 }
 0x3a9   :  { %v1299_v49 = vpop.f32.mrf.mxu0  ;;  %v1340_v51 = vpop.f32.mrf.mxu1 }
 0x3aa   :  { %v1429_v34 = vmul.f32 %v1299_v49, %v1299_v49  ;;  %v1431_v0 = vmul.f32 %v1340_v51, %v1340_v51 }
 0x3ab   :  { %v1301_v53 = vpop.f32.mrf.mxu0  ;;  %v1342_v55 = vpop.f32.mrf.mxu1 }
 0x3ac   :  { %v1430_v38 = vmul.f32 %v1301_v53, %v1301_v53  ;;  %v1437_v44 = vsel %vm810_vm0, %v1429_v34, 0.0  ;;  %v1440_v22 = vsel %vm810_vm0, %v1431_v0, 0.0  ;;  %v1432_v15 = vmul.f32 %v1342_v55, %v1342_v55 }
 0x3ad   :  { %v1303_v56 = vpop.f32.mrf.mxu0  ;;  %v1344_v58 = vpop.f32.mrf.mxu1 }
 0x3ae   :  { %v1438_v3 = vsel %vm810_vm0, %v1430_v38, 0.0  ;;  %v1442_v56 = vsel %vm810_vm0, %v1432_v15, 0.0 }
 0x3af   :  { %v1304_v30 = vpop.f32.mrf.mxu0  ;;  %v1345_v36 = vpop.f32.mrf.mxu1  ;;  %v1439_v4 = vadd.f32 %v1438_v3, %v1437_v44 }
 0x3b1   :  { %v1441_v1 = vadd.f32 %v1440_v22, %v1439_v4 }
 0x3b3   :  { %v1443_v30 = vadd.f32 %v1442_v56, %v1441_v1 }
 0x3e9   :  { %v3774_v5 = vpop.f32.mrf.mxu0  ;;  %v3776_v23 = vpop.f32.mrf.mxu1 }
 0x3ea   :  { %v1433_v58 = vmul.f32 %v3774_v5, %v3774_v5  ;;  %v1435_v3 = vmul.f32 %v3776_v23, %v3776_v23 }
 0x3eb   :  { %v1383_v36 = vpop.f32.mrf.mxu0  ;;  %v1424_v38 = vpop.f32.mrf.mxu1 }
 0x3ec   :  { %v1444_v34 = vsel %vm810_vm0, %v1433_v58, 0.0  ;;  %v1434_v44 = vmul.f32 %v1383_v36, %v1383_v36  ;;  %v1436_v17 = vmul.f32 %v1424_v38, %v1424_v38  ;;  %v1448_v11 = vsel %vm810_vm0, %v1435_v3, 0.0 }
 0x3ed   :  { %v1445_v0 = vadd.f32 %v1444_v34, %v1443_v30  ;;  %v1385_v4 = vpop.f32.mrf.mxu0  ;;  %v1426_v22 = vpop.f32.mrf.mxu1 }
 0x3ee   :  { %v1446_v16 = vsel %vm810_vm0, %v1434_v44, 0.0  ;;  %v1450_v56 = vsel %vm810_vm0, %v1436_v17, 0.0 }
 0x3ef   :  { %v1447_v20 = vadd.f32 %v1446_v16, %v1445_v0  ;;  %v1386_v15 = vpop.f32.mrf.mxu0  ;;  %v1427_v12 = vpop.f32.mrf.mxu1 }
 0x3f1   :  { %v1449_v1 = vadd.f32 %v1448_v11, %v1447_v20  ;;  %v4403_v20 = vld [vmem:[#allocation5_spill] sm:$0xff] }
 0x3f3   :  { %v1451_v21 = vadd.f32 %v1450_v56, %v1449_v1 }
 0x3f5   :  { %1452 = vadd.xlane.f32.xlu1 %v1451_v21  ;;  %v3873_v21 = vld [vmem:[%s4184_s2 + $0x48] sm:$0xff]  }
 0x47e   :  { %v1453_v58 = vpop.xlane.xlu1 %1452 }
 0x47f   :  { %v1454_v26 = vadd.f32 1e-16, %v1453_v58 }
 0x481   :  { %2770 = vrsqrt.f32 %v1454_v26  ;;  %v3880_v26 = vld [vmem:[%s4184_s2 + $0xc8] sm:$0xff]  }
 0x48e   :  { %v2771_v8 = vpop.eup %2770 }
 0x48f   :  { %v1457_v30 = vmul.f32 %v2771_v8, %v1301_v53  ;;  %v1459_v34 = vmul.f32 %v2771_v8, %v1342_v55  ;;  %v1456_v4 = vmul.f32 %v2771_v8, %v1299_v49  ;;  %v1458_v22 = vmul.f32 %v2771_v8, %v1340_v51 }
 0x490   :  { %v1461_v44 = vmul.f32 %v2771_v8, %v1383_v36  ;;  %v1463_v6 = vmul.f32 %v2771_v8, %v1424_v38 }
 0x491   :  { %v1465_v16 = vpack.c.bf16 %v1457_v30, %v1457_v30  ;;  %v1467_v0 = vpack.c.bf16 %v1459_v34, %v1459_v34  ;;  %v1464_v12 = vpack.c.bf16 %v1456_v4, %v1456_v4  ;;  %v1466_v15 = vpack.c.bf16 %v1458_v22, %v1458_v22 }
 0x492   :  { %v1469_v11 = vpack.c.bf16 %v1461_v44, %v1461_v44  ;;  %v1471_v17 = vpack.c.bf16 %v1463_v6, %v1463_v6  ;;  %v3864_v6 = vld [vmem:[%s4184_s2 + $0xd0] sm:$0xff]  }
 0x493   :  { %1504 = vmatprep.mubr.bf16.mxu0 %v1465_v16  ;;  %1544 = vmatprep.mubr.bf16.mxu1 %v1467_v0 }
 0x494   :  { %1505 = vmatmul.mubr.bf16.vlgmr.msra.gmra.mxu0 %v1464_v12  ;;  %1545 = vmatmul.mubr.bf16.vlgmr.msra.gmra.mxu1 %v1466_v15  ;;  %v4408_v12 = vld [vmem:[#allocation29_spill] sm:$0xff] }
 0x495   :  { %2428 = vmatpush3.bf16.msra.mxu0 %v3155_v33  ;;  %2450 = vmatpush3.bf16.msra.mxu1 %v3166_v41  ;;  %v1460_v33 = vmul.f32 %v2771_v8, %v3774_v5  ;;  %v3889_v5 = vld [vmem:[%s4184_s2 + $0x40] sm:$0xff]  }
 0x496   :  { %1584 = vmatprep.mubr.bf16.mxu0 %v1469_v11  ;;  %1624 = vmatprep.mubr.bf16.mxu1 %v1471_v17 }
 0x497   :  { %2429 = vmatprep.subr.bf16.mxu0 %v3161_v37  ;;  %2451 = vmatprep.subr.bf16.mxu1 %v3171_v43  ;;  %v1462_v37 = vmul.f32 %v2771_v8, %v3776_v23  ;;  %v1468_v41 = vpack.c.bf16 %v1460_v33, %v1460_v33  ;;  %v4402_v8 = vld [vmem:[#allocation38_spill] sm:$0xff] }
 0x498   :  { %v4404_v23 = vld [vmem:[#allocation6_spill] sm:$0xff] }
 0x499   :  { %2430 = vmatpush3.bf16.msra.mxu0 %v3177_v46  ;;  %2452 = vmatpush3.bf16.msra.mxu1 %v3189_v50  ;;  %v1470_v43 = vpack.c.bf16 %v1462_v37, %v1462_v37  ;;  %v4389_v46 = vld [vmem:[#allocation30_spill] sm:$0xff]  ;;  %v4391_v50 = vld [vmem:[#allocation27_spill] sm:$0xff] }
 0x49a   :  { %2431 = vmatprep.subr.bf16.mxu0 %v3183_v48  ;;  %2453 = vmatprep.subr.bf16.mxu1 %v3195_v52  ;;  %v4390_v48 = vld [vmem:[#allocation31_spill] sm:$0xff]  ;;  %v4392_v52 = vld [vmem:[#allocation28_spill] sm:$0xff] }
 0x49d   :  { %2432 = vmatpush3.bf16.msra.mxu0 %v3201_v54  ;;  %2454 = vmatpush3.bf16.msra.mxu1 %v3213_v9  ;;  %v4393_v54 = vld [vmem:[#allocation32_spill] sm:$0xff]  ;;  %v4395_v9 = vld [vmem:[#allocation45_spill] sm:$0xff] }
 0x49e   :  { %2433 = vmatprep.subr.bf16.mxu0 %v3207_v57  ;;  %2455 = vmatprep.subr.bf16.mxu1 %v3219_v10  ;;  %v4394_v57 = vld [vmem:[#allocation33_spill] sm:$0xff]  ;;  %v4396_v10 = vld [vmem:[#allocation46_spill] sm:$0xff] }
 0x4a1   :  { %2434 = vmatpush3.bf16.msra.mxu0 %v3225_v14  ;;  %2456 = vmatpush3.bf16.msra.mxu1 %v3237_v19  ;;  %v4397_v14 = vld [vmem:[#allocation34_spill] sm:$0xff]  ;;  %v4399_v19 = vld [vmem:[#allocation49_spill] sm:$0xff] }
 0x4a2   :  { %2435 = vmatprep.subr.bf16.mxu0 %v3231_v18  ;;  %2457 = vmatprep.subr.bf16.mxu1 %v3243_v24  ;;  %v4398_v18 = vld [vmem:[#allocation35_spill] sm:$0xff] }
 0x4a3   :  { %v3848_v24 = vld [vmem:[%s4184_s2 + $0xd8] sm:$0xff]  }
 0x4a5   :  { %2436 = vmatpush3.bf16.msra.mxu0 %v3249_v27  ;;  %2458 = vmatpush3.bf16.msra.mxu1 %v4356_v39  ;;  %v4400_v27 = vld [vmem:[#allocation36_spill] sm:$0xff] }
 0x4a6   :  { %2437 = vmatprep.subr.bf16.mxu0 %v4358_v35  ;;  %2459 = vmatprep.subr.bf16.mxu1 %v4359_v13 }
 0x4a9   :  { %2438 = vmatpush3.bf16.msra.mxu0 %v4360_v47  ;;  %2460 = vmatpush3.bf16.msra.mxu1 %v4362_v42  ;;  %v3912_v42 = vld [vmem:[%s4184_s2 + $0x1f8] sm:$0xff]  }
 0x4aa   :  { %2439 = vmatprep.subr.bf16.mxu0 %v4364_v25  ;;  %2461 = vmatprep.subr.bf16.mxu1 %v4365_v7 }
 0x4ad   :  { %2440 = vmatpush3.bf16.msra.mxu0 %v4366_v2  ;;  %2462 = vmatpush3.bf16.msra.mxu1 %v4368_v28  ;;  %v4406_v28 = vld [vmem:[#allocation7_spill] sm:$0xff]  ;;  %v4407_v2 = vld [vmem:[#allocation9_spill] sm:$0xff] }
 0x4ae   :  { %2441 = vmatprep.subr.bf16.mxu0 %v4370_v45  ;;  %2463 = vmatprep.subr.bf16.mxu1 %v4371_v40  ;;  %v3905_v40 = vld [vmem:[%s4184_s2 + $0x178] sm:$0xff]  }
 0x4b1   :  { %2442 = vmatpush3.bf16.msra.mxu0 %v4372_v60  ;;  %2464 = vmatpush3.bf16.msra.mxu1 %v4374_v63  ;;  %v4405_v63 = vld [vmem:[#allocation8_spill] sm:$0xff] }
 0x4b2   :  { %2663 = vmatprep.subr.msk.bf16.mxu0 %vm1069_vm2, %v3653_v59  ;;  %2671 = vmatprep.subr.msk.bf16.mxu1 %vm1069_vm2, %v3659_v29  ;;  %v3896_v60 = vld [vmem:[%s4184_s2 + $0xc0] sm:$0xff]  }
 0x4b4   :  { %1585 = vmatmul.mubr.bf16.vlgmr.msra.gmra.mxu0 %v1468_v41  ;;  %1625 = vmatmul.mubr.bf16.vlgmr.msra.gmra.mxu1 %v1470_v43 }
 0x4b5   :  { %2472 = vmatpush3.bf16.xpose.msra.mxu0 %v3419_v62  ;;  %2490 = vmatpush3.bf16.xpose.msra.mxu1 %v3423_v61  ;;  %v4401_v62 = vld [vmem:[#allocation37_spill] sm:$0xff]  ;;  %v3857_v61 = vld [vmem:[%s4184_s2 + $0x50] sm:$0xff]  }
 0x4b6   :  { %2664 = vmatprep.subr.msk.bf16.mxu0 %vm1069_vm2, %v3679_v31  ;;  %2672 = vmatprep.subr.msk.bf16.mxu1 %vm1069_vm2, %v3685_v32 }
 0x4bd   :  { %2474 = vmatpush3.bf16.xpose.msra.mxu0 %v4389_v46  ;;  %2492 = vmatpush3.bf16.xpose.msra.mxu1 %v4390_v48 }
 0x4be   :  { %2665 = vmatprep.subr.msk.bf16.mxu0 %vm1069_vm2, %v4391_v50  ;;  %2673 = vmatprep.subr.msk.bf16.mxu1 %vm1069_vm2, %v4392_v52 }
 0x4c5   :  { %2476 = vmatpush3.bf16.xpose.msra.mxu0 %v4393_v54  ;;  %2494 = vmatpush3.bf16.xpose.msra.mxu1 %v4394_v57  ;;  %v4409_v57 = vld [vmem:[#allocation10_spill] sm:$0xff] }
 0x4c6   :  { %2666 = vmatprep.subr.msk.bf16.mxu0 %vm1069_vm2, %v4395_v9  ;;  %2674 = vmatprep.subr.msk.bf16.mxu1 %vm1069_vm2, %v4396_v10 }
 0x4cd   :  { %2478 = vmatpush3.bf16.xpose.msra.mxu0 %v4397_v14  ;;  %2496 = vmatpush3.bf16.xpose.msra.mxu1 %v4398_v18 }
 0x4ce   :  { %2667 = vmatprep.subr.msk.bf16.mxu0 %vm1069_vm2, %v4399_v19  ;;  %2675 = vmatprep.subr.msk.bf16.mxu1 %vm1069_vm2, %v3848_v24 }
 0x4d5   :  { %2480 = vmatpush3.bf16.xpose.msra.mxu0 %v4400_v27  ;;  %2498 = vmatpush3.bf16.xpose.msra.mxu1 %v4401_v62  ;;  %v4410_v27 = vld [vmem:[#allocation12_spill] sm:$0xff]  ;;  %v4411_v62 = vld [vmem:[#allocation11_spill] sm:$0xff] }
 0x4d6   :  { %2668 = vmatprep.subr.msk.bf16.mxu0 %vm1069_vm2, %v3857_v61  ;;  %2676 = vmatprep.subr.msk.bf16.mxu1 %vm1069_vm2, %v3864_v6 }
 0x4dd   :  { %2482 = vmatpush3.bf16.xpose.msra.mxu0 %v4402_v8  ;;  %2500 = vmatpush3.bf16.xpose.msra.mxu1 %v4403_v20  ;;  %v3931_v8 = vld [vmem:[%s4184_s2 + $0x170] sm:$0xff]  }
 0x4de   :  { %2669 = vmatprep.subr.msk.bf16.mxu0 %vm1069_vm2, %v3873_v21  ;;  %2677 = vmatprep.subr.msk.bf16.mxu1 %vm1069_vm2, %v3880_v26  ;;  %v3938_v20 = vld [vmem:[%s4184_s2 + $0x1f0] sm:$0xff]  }
 0x4e5   :  { %2484 = vmatpush3.bf16.xpose.msra.mxu0 %v4404_v23  ;;  %2502 = vmatpush3.bf16.xpose.msra.mxu1 %v4405_v63  ;;  %v4412_v23 = vld [vmem:[#allocation13_spill] sm:$0xff]  ;;  %v4413_v63 = vld [vmem:[#allocation14_spill] sm:$0xff] }
 0x4e6   :  { %2670 = vmatprep.subr.msk.bf16.mxu0 %vm1069_vm2, %v3889_v5  ;;  %2678 = vmatprep.subr.msk.bf16.mxu1 %vm1069_vm2, %v3896_v60 }
 0x4ed   :  { %2486 = vmatpush3.bf16.xpose.msra.mxu0 %v4406_v28  ;;  %2504 = vmatpush3.bf16.xpose.msra.mxu1 %v4407_v2  ;;  %v3947_v28 = vld [vmem:[%s4184_s2 + $0x168] sm:$0xff]  }
 0x4ee   :  { %2679 = vmatprep.subr.msk.bf16.mxu0 %vm1069_vm2, %v3905_v40  ;;  %2687 = vmatprep.subr.msk.bf16.mxu1 %vm1069_vm2, %v3912_v42  ;;  %v3954_v2 = vld [vmem:[%s4184_s2 + $0x1e8] sm:$0xff]  }
 0x554   :  { %v2399_v45 = vpop.f32.mrf.mxu0  ;;  %v2421_v47 = vpop.f32.mrf.mxu1 }
 0x556   :  { %v2400_v35 = vpop.f32.mrf.mxu0  ;;  %v2422_v13 = vpop.f32.mrf.mxu1 }
 0x557   :  { %v2401_v51 = vadd.f32 %v2400_v35, %v2399_v45  ;;  %v2423_v53 = vadd.f32 %v2422_v13, %v2421_v47  ;;  %v4414_v45 = vld [vmem:[#allocation15_spill] sm:$0xff]  ;;  %v3963_v35 = vld [vmem:[%s4184_s2 + $0x160] sm:$0xff]  }
 0x558   :  { %v2402_v25 = vpop.f32.mrf.mxu0  ;;  %v2424_v39 = vpop.f32.mrf.mxu1  ;;  %v4415_v47 = vld [vmem:[#allocation39_spill] sm:$0xff]  ;;  %v3970_v13 = vld [vmem:[%s4184_s2 + $0x1e0] sm:$0xff]  }
 0x559   :  { %v1547_v1 = vadd.f32 %v2423_v53, %v2401_v51  ;;  %v4416_v25 = vld [vmem:[#allocation40_spill] sm:$0xff]  ;;  %v4417_v39 = vld [vmem:[#allocation41_spill] sm:$0xff]  ;;  %v4418_v51 = vld [vmem:[#allocation42_spill] sm:$0xff] }
 0x55a   :  { %v2403_v7 = vpop.f32.mrf.mxu0  ;;  %v2425_v49 = vpop.f32.mrf.mxu1  ;;  %v4419_v53 = vld [vmem:[#allocation17_spill] sm:$0xff] }
 0x55b   :  { %v3979_v7 = vld [vmem:[%s4184_s2 + $0x158] sm:$0xff]  }
 0x55c   :  { %v3986_v49 = vld [vmem:[%s4184_s2 + $0x1d8] sm:$0xff]  }
 0x574   :  { %v2443_v55 = vpop.f32.mrf.mxu0  ;;  %v2465_v36 = vpop.f32.mrf.mxu1 }
 0x576   :  { %v2444_v38 = vpop.f32.mrf.mxu0  ;;  %v2466_v3 = vpop.f32.mrf.mxu1 }
 0x577   :  { %v2445_v56 = vadd.f32 %v2444_v38, %v2443_v55  ;;  %v2467_v4 = vadd.f32 %v2466_v3, %v2465_v36  ;;  %v3995_v55 = vld [vmem:[%s4184_s2 + $0x150] sm:$0xff]   ;;  %v4420_v38 = vld [vmem:[#allocation16_spill] sm:$0xff] }
 0x578   :  { %v2446_v58 = vpop.f32.mrf.mxu0  ;;  %v2468_v30 = vpop.f32.mrf.mxu1  ;;  %v4002_v36 = vld [vmem:[%s4184_s2 + $0x1d0] sm:$0xff]  }
 0x579   :  { %v1587_v34 = vadd.f32 %v2445_v56, %v1547_v1  ;;  %v4421_v3 = vld [vmem:[#allocation18_spill] sm:$0xff]  ;;  %v4422_v58 = vld [vmem:[#allocation19_spill] sm:$0xff]  ;;  %v4423_v30 = vld [vmem:[#allocation21_spill] sm:$0xff] }
 0x57a   :  { %v2447_v22 = vpop.f32.mrf.mxu0  ;;  %v2469_v44 = vpop.f32.mrf.mxu1  ;;  %v4011_v1 = vld [vmem:[%s4184_s2 + $0x148] sm:$0xff]  }
 0x57b   :  { %v1627_v16 = vadd.f32 %v2467_v4, %v1587_v34  ;;  %v4018_v56 = vld [vmem:[%s4184_s2 + $0x1c8] sm:$0xff]   ;;  %v4027_v34 = vld [vmem:[%s4184_s2 + $0x140] sm:$0xff]  }
 0x57c   :  { %v4034_v4 = vld [vmem:[%s4184_s2 + $0x1c0] sm:$0xff]   ;;  %v4425_v44 = vld [vmem:[#allocation22_spill] sm:$0xff] }
 0x57d   :  { %v1632_v0 = vmul.f32 10.0, %v1627_v16  ;;  %v4424_v22 = vld [vmem:[#allocation20_spill] sm:$0xff]  ;;  %v4426_v16 = vld [vmem:[#allocation23_spill] sm:$0xff] }
 0x57f   :  { %v1633_v15 = vadd.f32 %v1632_v0, %v4408_v12  ;;  %v4427_v0 = vld [vmem:[#allocation25_spill] sm:$0xff] }
 0x581   :  { %v1634_v11 = vsel %vm1055_vm1, %v1633_v15, -inf }
 0x582   :  { %1635 = vmax.xlane.f32.xlu0 %v1634_v11  ;;  %v4429_v11 = vld [vmem:[#allocation26_spill] sm:$0xff] }
 0x60b   :  { %v1636_v17 = vpop.xlane.xlu0 %1635 }
 0x60c   :  { %v1637_v33 = vsub.f32 %v1633_v15, %v1636_v17  ;;  %v4428_v15 = vld [vmem:[#allocation24_spill] sm:$0xff]  ;;  %v4432_v17 = vld [vmem:[#allocation47_spill] sm:$0xff] }
 0x60e   :  { %v1638_v37 = vmul.f32 1.442695, %v1637_v33 }
 0x610   :  { %2772 = vpow2.f32 %v1638_v37 }
 0x61d   :  { %v2773_v41 = vpop.eup %2772 }
 0x61e   :  { %v1640_v43 = vsel %vm1055_vm1, %v2773_v41, 0.0 }
 0x61f   :  { %1641 = vadd.xlane.f32.xlu1 %v1640_v43 }
 0x6a8   :  { %v1642_v46 = vpop.xlane.xlu1 %1641 }
 0x6a9   :  { %2774 = vrcp.f32 %v1642_v46 }
 0x6b6   :  { %v2775_v48 = vpop.eup %2774 }
 0x6b7   :  { %v1644_v54 = vmul.f32 %v2775_v48, %v2773_v41 }
 0x6b9   :  { %v1645_v14 = vsub.f32 %v1644_v54, %v4409_v57 }
 0x6bb   :  { %v1646_v18 = vpack.c.bf16 %v1645_v14, %v1645_v14 }
 0x6bd   :  { %2487 = vmatprep.mubr.msk.bf16.mxu0 %vm1069_vm2, %v1646_v18  ;;  %2505 = vmatprep.mubr.msk.bf16.mxu1 %vm1069_vm2, %v1646_v18 }
 0x6be   :  { %2488 = vmatmul.mubr.msk.bf16.vlgmr.msra.gmra.mxu0 %vm1069_vm2, %v1646_v18  ;;  %2506 = vmatmul.mubr.msk.bf16.vlgmr.msra.gmra.mxu1 %vm1069_vm2, %v1646_v18 }
 0x6bf   :  { %2508 = vmatpush3.bf16.xpose.msra.mxu0 %v4410_v27  ;;  %2526 = vmatpush3.bf16.xpose.msra.mxu1 %v4411_v62 }
 0x6c0   :  { %2523 = vmatprep.mubr.msk.bf16.mxu0 %vm1069_vm2, %v1646_v18  ;;  %2541 = vmatprep.mubr.msk.bf16.mxu1 %vm1069_vm2, %v1646_v18 }
 0x6c1   :  { %2680 = vmatprep.subr.msk.bf16.mxu0 %vm1069_vm2, %v3931_v8  ;;  %2688 = vmatprep.subr.msk.bf16.mxu1 %vm1069_vm2, %v3938_v20 }
 0x6c7   :  { %2510 = vmatpush3.bf16.xpose.msra.mxu0 %v4412_v23  ;;  %2528 = vmatpush3.bf16.xpose.msra.mxu1 %v4413_v63 }
 0x6c8   :  { %2681 = vmatprep.subr.msk.bf16.mxu0 %vm1069_vm2, %v3947_v28  ;;  %2689 = vmatprep.subr.msk.bf16.mxu1 %vm1069_vm2, %v3954_v2 }
 0x6cf   :  { %2512 = vmatpush3.bf16.xpose.msra.mxu0 %v4414_v45  ;;  %2530 = vmatpush3.bf16.xpose.msra.mxu1 %v4415_v47 }
 0x6d0   :  { %2682 = vmatprep.subr.msk.bf16.mxu0 %vm1069_vm2, %v3963_v35  ;;  %2690 = vmatprep.subr.msk.bf16.mxu1 %vm1069_vm2, %v3970_v13 }
 0x6d7   :  { %2514 = vmatpush3.bf16.xpose.msra.mxu0 %v4416_v25  ;;  %2532 = vmatpush3.bf16.xpose.msra.mxu1 %v4417_v39 }
 0x6d8   :  { %2683 = vmatprep.subr.msk.bf16.mxu0 %vm1069_vm2, %v3979_v7  ;;  %2691 = vmatprep.subr.msk.bf16.mxu1 %vm1069_vm2, %v3986_v49 }
 0x6df   :  { %2516 = vmatpush3.bf16.xpose.msra.mxu0 %v4418_v51  ;;  %2534 = vmatpush3.bf16.xpose.msra.mxu1 %v4419_v53 }
 0x6e0   :  { %2684 = vmatprep.subr.msk.bf16.mxu0 %vm1069_vm2, %v3995_v55  ;;  %2692 = vmatprep.subr.msk.bf16.mxu1 %vm1069_vm2, %v4002_v36 }
 0x6e7   :  { %2518 = vmatpush3.bf16.xpose.msra.mxu0 %v4420_v38  ;;  %2536 = vmatpush3.bf16.xpose.msra.mxu1 %v4421_v3 }
 0x6e8   :  { %2685 = vmatprep.subr.msk.bf16.mxu0 %vm1069_vm2, %v4011_v1  ;;  %2693 = vmatprep.subr.msk.bf16.mxu1 %vm1069_vm2, %v4018_v56 }
 0x6ef   :  { %2520 = vmatpush3.bf16.xpose.msra.mxu0 %v4422_v58  ;;  %2538 = vmatpush3.bf16.xpose.msra.mxu1 %v4423_v30 }
 0x6f0   :  { %2686 = vmatprep.subr.msk.bf16.mxu0 %vm1069_vm2, %v4027_v34  ;;  %2694 = vmatprep.subr.msk.bf16.mxu1 %vm1069_vm2, %v4034_v4 }
 0x6f7   :  { %2522 = vmatpush3.bf16.xpose.msra.mxu0 %v4424_v22  ;;  %2540 = vmatpush3.bf16.xpose.msra.mxu1 %v4425_v44 }
 0x6f8   :  { %2543 = vmatprep.subr.bf16.mxu0 %v3653_v59  ;;  %2565 = vmatprep.subr.bf16.mxu1 %v3659_v29  ;;  %v4430_v59 = vld [vmem:[#allocation43_spill] sm:$0xff]  ;;  %v4431_v29 = vld [vmem:[#allocation44_spill] sm:$0xff] }
 0x6fe   :  { %2524 = vmatmul.mubr.msk.bf16.vlgmr.msra.gmra.mxu0 %vm1069_vm2, %v1646_v18  ;;  %2542 = vmatmul.mubr.msk.bf16.vlgmr.msra.gmra.mxu1 %vm1069_vm2, %v1646_v18 }
 0x6ff   :  { %2544 = vmatpush3.bf16.msra.mxu0 %v4426_v16  ;;  %2566 = vmatpush3.bf16.msra.mxu1 %v4427_v0 }
 0x700   :  { %2545 = vmatprep.subr.bf16.mxu0 %v3679_v31  ;;  %2567 = vmatprep.subr.bf16.mxu1 %v3685_v32  ;;  %v4433_v31 = vld [vmem:[#allocation48_spill] sm:$0xff] }
 0x701   :  { %v2826_v32 = vld [vmem:[%s4184_s2 + $0x18] sm:$0xff]  }
 0x703   :  { %2546 = vmatpush3.bf16.msra.mxu0 %v4428_v15  ;;  %2568 = vmatpush3.bf16.msra.mxu1 %v4429_v11 }
 0x704   :  { %2547 = vmatprep.subr.bf16.mxu0 %v4391_v50  ;;  %2569 = vmatprep.subr.bf16.mxu1 %v4392_v52  ;;  %v2827_v50 = vld [vmem:[%s4184_s2 + $0x98] sm:$0xff]   ;;  %v2828_v52 = vld [vmem:[%s4184_s2 + $0x10] sm:$0xff]  }
 0x707   :  { %2548 = vmatpush3.bf16.msra.mxu0 %v4430_v59  ;;  %2570 = vmatpush3.bf16.msra.mxu1 %v4431_v29 }
 0x708   :  { %2549 = vmatprep.subr.bf16.mxu0 %v4395_v9  ;;  %2571 = vmatprep.subr.bf16.mxu1 %v4396_v10  ;;  %v2829_v9 = vld [vmem:[%s4184_s2 + $0x90] sm:$0xff]   ;;  %v2830_v10 = vld [vmem:[%s4184_s2 + $0x8] sm:$0xff]  }
 0x70b   :  { %2550 = vmatpush3.bf16.msra.mxu0 %v4432_v17  ;;  %2572 = vmatpush3.bf16.msra.mxu1 %v4433_v31 }
 0x70c   :  { %2551 = vmatprep.subr.bf16.mxu0 %v4399_v19  ;;  %2573 = vmatprep.subr.bf16.mxu1 %v3848_v24  ;;  %v2831_v19 = vld [vmem:[%s4184_s2 + $0x88] sm:$0xff]   ;;  %v2832_v24 = vld [vmem:[%s4184_s2] sm:$0xff]  }
 0x70f   :  { %2552 = vmatpush3.bf16.msra.mxu0 %v2826_v32  ;;  %2574 = vmatpush3.bf16.msra.mxu1 %v2827_v50 }
 0x710   :  { %2553 = vmatprep.subr.bf16.mxu0 %v3857_v61  ;;  %2575 = vmatprep.subr.bf16.mxu1 %v3864_v6  ;;  %v2833_v61 = vld [vmem:[%s4184_s2 + $0x80] sm:$0xff]  }
 0x713   :  { %2554 = vmatpush3.bf16.msra.mxu0 %v2828_v52  ;;  %2576 = vmatpush3.bf16.msra.mxu1 %v2829_v9 }
 0x714   :  { %2555 = vmatprep.subr.bf16.mxu0 %v3873_v21  ;;  %2577 = vmatprep.subr.bf16.mxu1 %v3880_v26 }
 0x717   :  { %2556 = vmatpush3.bf16.msra.mxu0 %v2830_v10  ;;  %2578 = vmatpush3.bf16.msra.mxu1 %v2831_v19 }
 0x718   :  { %2557 = vmatprep.subr.bf16.mxu0 %v3889_v5  ;;  %2579 = vmatprep.subr.bf16.mxu1 %v3896_v60 }
 0x71b   :  { %2558 = vmatpush3.bf16.msra.mxu0 %v2832_v24  ;;  %2580 = vmatpush3.bf16.msra.mxu1 %v2833_v61 }
 0x71c   :  { %2587 = vmatprep.subr.bf16.mxu0 %v3905_v40  ;;  %2609 = vmatprep.subr.bf16.mxu1 %v3912_v42 }
 0x77e   :  { %v1684_v6 = vpop.f32.mrf.mxu0  ;;  %v1725_v21 = vpop.f32.mrf.mxu1 }
 0x77f   :  { %v1814_v46 = vmul.f32 %v1684_v6, %v1684_v6  ;;  %v1816_v14 = vmul.f32 %v1725_v21, %v1725_v21 }
 0x780   :  { %v1686_v26 = vpop.f32.mrf.mxu0  ;;  %v1727_v5 = vpop.f32.mrf.mxu1 }
 0x781   :  { %v1815_v43 = vmul.f32 %v1686_v26, %v1686_v26  ;;  %v1822_v54 = vsel %vm810_vm0, %v1814_v46, 0.0  ;;  %v1825_v40 = vsel %vm810_vm0, %v1816_v14, 0.0  ;;  %v1817_v27 = vmul.f32 %v1727_v5, %v1727_v5 }
 0x782   :  { %v1688_v33 = vpop.f32.mrf.mxu0  ;;  %v1729_v60 = vpop.f32.mrf.mxu1 }
 0x783   :  { %v1823_v48 = vsel %vm810_vm0, %v1815_v43, 0.0  ;;  %v1827_v63 = vsel %vm810_vm0, %v1817_v27, 0.0 }
 0x784   :  { %v1689_v37 = vpop.f32.mrf.mxu0  ;;  %v1730_v41 = vpop.f32.mrf.mxu1  ;;  %v1824_v18 = vadd.f32 %v1823_v48, %v1822_v54  ;;  %v2834_v48 = vld [vmem:[%s4184_s2 + $0x138] sm:$0xff]   ;;  %v2849_v54 = vld [vmem:[%s4184_s2 + $0x180] sm:$0xff]  }
 0x786   :  { %v1826_v42 = vadd.f32 %v1825_v40, %v1824_v18 }
 0x788   :  { %v1828_v47 = vadd.f32 %v1827_v63, %v1826_v42 }
 0x7be   :  { %v4095_v62 = vpop.f32.mrf.mxu0  ;;  %v4097_v23 = vpop.f32.mrf.mxu1 }
 0x7bf   :  { %v1818_v45 = vmul.f32 %v4095_v62, %v4095_v62  ;;  %v1820_v53 = vmul.f32 %v4097_v23, %v4097_v23 }
 0x7c0   :  { %v1768_v25 = vpop.f32.mrf.mxu0  ;;  %v1809_v39 = vpop.f32.mrf.mxu1 }
 0x7c1   :  { %v1829_v51 = vsel %vm810_vm0, %v1818_v45, 0.0  ;;  %v1819_v38 = vmul.f32 %v1768_v25, %v1768_v25  ;;  %v1821_v44 = vmul.f32 %v1809_v39, %v1809_v39  ;;  %v1833_v11 = vsel %vm810_vm0, %v1820_v53, 0.0 }
 0x7c2   :  { %v1830_v3 = vadd.f32 %v1829_v51, %v1828_v47  ;;  %v1770_v58 = vpop.f32.mrf.mxu0  ;;  %v1811_v30 = vpop.f32.mrf.mxu1 }
 0x7c3   :  { %v1831_v22 = vsel %vm810_vm0, %v1819_v38, 0.0  ;;  %v1835_v29 = vsel %vm810_vm0, %v1821_v44, 0.0 }
 0x7c4   :  { %v1832_v16 = vadd.f32 %v1831_v22, %v1830_v3  ;;  %v1771_v0 = vpop.f32.mrf.mxu0  ;;  %v1812_v15 = vpop.f32.mrf.mxu1 }
 0x7c6   :  { %v1834_v59 = vadd.f32 %v1833_v11, %v1832_v16 }
 0x7c8   :  { %v1836_v17 = vadd.f32 %v1835_v29, %v1834_v59 }
 0x7ca   :  { %1837 = vadd.xlane.f32.xlu0 %v1836_v17 }
 0x853   :  { %v1838_v31 = vpop.xlane.xlu0 %1837 }
 0x854   :  { %v1839_v32 = vadd.f32 1e-16, %v1838_v31 }
 0x856   :  { %2776 = vrsqrt.f32 %v1839_v32 }
 0x863   :  { %v2777_v50 = vpop.eup %2776 }
 0x864   :  { %v1842_v52 = vmul.f32 %v2777_v50, %v1686_v26  ;;  %v1844_v9 = vmul.f32 %v2777_v50, %v1727_v5  ;;  %v1841_v10 = vmul.f32 %v2777_v50, %v1684_v6  ;;  %v1843_v19 = vmul.f32 %v2777_v50, %v1725_v21  ;;  %v2835_v6 = vld [vmem:[%s4184_s2 + $0x1b8] sm:$0xff]   ;;  %v2836_v21 = vld [vmem:[%s4184_s2 + $0x130] sm:$0xff]  }
 0x865   :  { %v1846_v24 = vmul.f32 %v2777_v50, %v1768_v25  ;;  %v1848_v61 = vmul.f32 %v2777_v50, %v1809_v39  ;;  %v2837_v26 = vld [vmem:[%s4184_s2 + $0x1b0] sm:$0xff]   ;;  %v1845_v5 = vmul.f32 %v2777_v50, %v4095_v62 }
 0x866   :  { %v1850_v33 = vpack.c.bf16 %v1842_v52, %v1842_v52  ;;  %v1852_v60 = vpack.c.bf16 %v1844_v9, %v1844_v9  ;;  %v1849_v37 = vpack.c.bf16 %v1841_v10, %v1841_v10  ;;  %v1851_v41 = vpack.c.bf16 %v1843_v19, %v1843_v19 }
 0x867   :  { %v1854_v43 = vpack.c.bf16 %v1846_v24, %v1846_v24  ;;  %v1856_v46 = vpack.c.bf16 %v1848_v61, %v1848_v61  ;;  %v1853_v14 = vpack.c.bf16 %v1845_v5, %v1845_v5  ;;  %v2029_v9 = vadd.f32 1e-16, %v4409_v57 }
 0x868   :  { %1889 = vmatprep.mubr.bf16.mxu0 %v1850_v33  ;;  %1929 = vmatprep.mubr.bf16.mxu1 %v1852_v60 }
 0x869   :  { %1890 = vmatmul.mubr.bf16.vlgmr.msra.gmra.mxu0 %v1849_v37  ;;  %1930 = vmatmul.mubr.bf16.vlgmr.msra.gmra.mxu1 %v1851_v41 }
 0x86a   :  { %2588 = vmatpush3.bf16.msra.mxu0 %v2834_v48  ;;  %2610 = vmatpush3.bf16.msra.mxu1 %v2835_v6 }
 0x86b   :  { %1969 = vmatprep.mubr.bf16.mxu0 %v1854_v43  ;;  %2009 = vmatprep.mubr.bf16.mxu1 %v1856_v46 }
 0x86c   :  { %2589 = vmatprep.subr.bf16.mxu0 %v3931_v8  ;;  %2611 = vmatprep.subr.bf16.mxu1 %v3938_v20  ;;  %v2838_v8 = vld [vmem:[%s4184_s2 + $0x128] sm:$0xff]  }
 0x86d   :  { %v2839_v20 = vld [vmem:[%s4184_s2 + $0x1a8] sm:$0xff]  }
 0x86e   :  { %2590 = vmatpush3.bf16.msra.mxu0 %v2836_v21  ;;  %2612 = vmatpush3.bf16.msra.mxu1 %v2837_v26 }
 0x86f   :  { %2591 = vmatprep.subr.bf16.mxu0 %v3947_v28  ;;  %2613 = vmatprep.subr.bf16.mxu1 %v3954_v2  ;;  %v2840_v28 = vld [vmem:[%s4184_s2 + $0x120] sm:$0xff]  }
 0x870   :  { %v2841_v2 = vld [vmem:[%s4184_s2 + $0x1a0] sm:$0xff]  }
 0x872   :  { %2592 = vmatpush3.bf16.msra.mxu0 %v2838_v8  ;;  %2614 = vmatpush3.bf16.msra.mxu1 %v2839_v20 }
 0x873   :  { %2593 = vmatprep.subr.bf16.mxu0 %v3963_v35  ;;  %2615 = vmatprep.subr.bf16.mxu1 %v3970_v13  ;;  %v2842_v35 = vld [vmem:[%s4184_s2 + $0x118] sm:$0xff]  }
 0x874   :  { %v2843_v13 = vld [vmem:[%s4184_s2 + $0x198] sm:$0xff]  }
 0x876   :  { %2594 = vmatpush3.bf16.msra.mxu0 %v2840_v28  ;;  %2616 = vmatpush3.bf16.msra.mxu1 %v2841_v2 }
 0x877   :  { %2595 = vmatprep.subr.bf16.mxu0 %v3979_v7  ;;  %2617 = vmatprep.subr.bf16.mxu1 %v3986_v49  ;;  %v2844_v7 = vld [vmem:[%s4184_s2 + $0x110] sm:$0xff]  }
 0x878   :  { %v2845_v49 = vld [vmem:[%s4184_s2 + $0x190] sm:$0xff]  }
 0x87a   :  { %2596 = vmatpush3.bf16.msra.mxu0 %v2842_v35  ;;  %2618 = vmatpush3.bf16.msra.mxu1 %v2843_v13 }
 0x87b   :  { %2597 = vmatprep.subr.bf16.mxu0 %v3995_v55  ;;  %2619 = vmatprep.subr.bf16.mxu1 %v4002_v36  ;;  %v2846_v55 = vld [vmem:[%s4184_s2 + $0x108] sm:$0xff]  }
 0x87c   :  { %v2847_v36 = vld [vmem:[%s4184_s2 + $0x188] sm:$0xff]  }
 0x87e   :  { %2598 = vmatpush3.bf16.msra.mxu0 %v2844_v7  ;;  %2620 = vmatpush3.bf16.msra.mxu1 %v2845_v49 }
 0x87f   :  { %2599 = vmatprep.subr.bf16.mxu0 %v4011_v1  ;;  %2621 = vmatprep.subr.bf16.mxu1 %v4018_v56  ;;  %v1847_v1 = vmul.f32 %v2777_v50, %v4097_v23  ;;  %v2848_v56 = vld [vmem:[%s4184_s2 + $0x100] sm:$0xff]   ;;  %s2875_s2 = smov [#allocation2]  }
 0x880   :  { %s2054_s30 = sshll.u32 %s2875_s2, 4  ;;  %s2055_s30 = int_to_ptr.vmem [resolvable:$true] %s2054_s30 }
 0x881   :  { %v1855_v18 = vpack.c.bf16 %v1847_v1, %v1847_v1  ;;  %s2850_s6 = scalar_lea.vmem %s2055_s30, 16  ;;  %s2854_s7 = scalar_lea.vmem %s2055_s30, 32 }
 0x882   :  { %2600 = vmatpush3.bf16.msra.mxu0 %v2846_v55  ;;  %2622 = vmatpush3.bf16.msra.mxu1 %v2847_v36  ;;  %p2851_p0 = scmp.ne.s32.totalorder %s2055_s30, %s2850_s6  ;;  %p2855_p1 = scmp.lt.s32.totalorder %s2055_s30, %s2055_s30 }
 0x883   :  { %2601 = vmatprep.subr.bf16.mxu0 %v4027_v34  ;;  %2623 = vmatprep.subr.bf16.mxu1 %v4034_v4  ;;  %p2856_p2 = scmp.lt.s32.totalorder %s2854_s7, %s2850_s6 }
 0x885   :  { %p2857_p3 = por %p2856_p2, %p2855_p1 }
 0x886   :  { %2602 = vmatpush3.bf16.msra.mxu0 %v2848_v56  ;;  %2624 = vmatpush3.bf16.msra.mxu1 %v2849_v54 }
 0x887   :  { %p2858_p4 = pnand %p2857_p3, %p2851_p0 }
 0x889   :  { %1970 = vmatmul.mubr.bf16.vlgmr.msra.gmra.mxu0 %v1853_v14  ;;  %2010 = vmatmul.mubr.bf16.vlgmr.msra.gmra.mxu1 %v1855_v18 }
 0x929   :  { %v2559_v34 = vpop.f32.mrf.mxu0  ;;  %v2581_v4 = vpop.f32.mrf.mxu1 }
 0x92b   :  { %v2560_v40 = vpop.f32.mrf.mxu0  ;;  %v2582_v27 = vpop.f32.mrf.mxu1 }
 0x92c   :  { %v2561_v45 = vadd.f32 %v2560_v40, %v2559_v34  ;;  %v2583_v47 = vadd.f32 %v2582_v27, %v2581_v4 }
 0x92d   :  { %v2562_v42 = vpop.f32.mrf.mxu0  ;;  %v2584_v62 = vpop.f32.mrf.mxu1 }
 0x92e   :  { %v1932_v38 = vadd.f32 %v2583_v47, %v2561_v45 }
 0x92f   :  { %v2563_v23 = vpop.f32.mrf.mxu0  ;;  %v2585_v63 = vpop.f32.mrf.mxu1 }
 0x949   :  { %v2603_v25 = vpop.f32.mrf.mxu0  ;;  %v2625_v39 = vpop.f32.mrf.mxu1 }
 0x94b   :  { %v2604_v51 = vpop.f32.mrf.mxu0  ;;  %v2626_v53 = vpop.f32.mrf.mxu1 }
 0x94c   :  { %v2605_v3 = vadd.f32 %v2604_v51, %v2603_v25  ;;  %v2627_v44 = vadd.f32 %v2626_v53, %v2625_v39 }
 0x94d   :  { %v2606_v58 = vpop.f32.mrf.mxu0  ;;  %v2628_v30 = vpop.f32.mrf.mxu1 }
 0x94e   :  { %v1972_v22 = vadd.f32 %v2605_v3, %v1932_v38 }
 0x94f   :  { %v2607_v16 = vpop.f32.mrf.mxu0  ;;  %v2629_v0 = vpop.f32.mrf.mxu1 }
 0x950   :  { %v2012_v15 = vadd.f32 %v2627_v44, %v1972_v22 }
 0x952   :  { %v2017_v11 = vadd.f32 %v2012_v15, %v4408_v12 }
 0x954   :  { %v2018_v59 = vsel %vm1055_vm1, %v2017_v11, -inf }
 0x955   :  { %2019 = vmax.xlane.f32.xlu1 %v2018_v59 }
 0x9de   :  { %v2020_v29 = vpop.xlane.xlu1 %2019 }
 0x9df   :  { %v2021_v17 = vsub.f32 %v2017_v11, %v2020_v29 }
 0x9e1   :  { %v2022_v31 = vmul.f32 1.442695, %v2021_v17 }
 0x9e3   :  { %2778 = vpow2.f32 %v2022_v31 }
 0x9f0   :  { %v2779_v32 = vpop.eup %2778 }
 0x9f1   :  { %v2024_v50 = vsel %vm1055_vm1, %v2779_v32, 0.0 }
 0x9f2   :  { %2025 = vadd.xlane.f32.xlu0 %v2024_v50 }
 0xa7b   :  { %v2026_v52 = vpop.xlane.xlu0 %2025 }
 0xa7c   :  { %2780 = vrcp.f32 %v2026_v52 }
 0xa7d   :  { %2782 = vlog2.f32 %v2029_v9 }
 0xa89   :  { %v2781_v10 = vpop.eup %2780 }
 0xa8a   :  { %v2028_v19 = vmul.f32 %v2781_v10, %v2779_v32  ;;  %v2783_v12 = vpop.eup %2782 }
 0xa8b   :  { %v2031_v61 = vmul.f32 0.6931472, %v2783_v12 }
 0xa8c   :  { %v2032_v24 = vadd.f32 1e-16, %v2028_v19 }
 0xa8e   :  { %2784 = vlog2.f32 %v2032_v24 }
 0xa9b   :  { %v2785_v33 = vpop.eup %2784 }
 0xa9c   :  { %v2034_v60 = vmul.f32 0.6931472, %v2785_v33 }
 0xa9e   :  { %v2035_v37 = vsub.f32 %v2031_v61, %v2034_v60 }
 0xaa0   :  { %v2036_v41 = vmul.f32 %v2035_v37, %v4409_v57 }
 0xaa2   :  { %v2037_v43 = vsel %vm1055_vm1, %v2036_v41, 0.0 }
 0xaa3   :  { %2038 = vadd.xlane.f32.xlu1 %v2037_v43 }
 0xb2c   :  { %v2039_v46 = vpop.xlane.xlu1 %2038 }
 0xb2d   :  { %v2040_v48 = vsel %vm810_vm0, %v2039_v46, 0.0 }
 0xb2e   :  { %v2041_v6 = vrot.slane %v2040_v48, 4 }
 0xb30   :  { %v2042_v21 = vadd.f32 %v2041_v6, %v2040_v48 }
 0xb32   :  { %v2043_v26 = vrot.slane %v2042_v21, 2 }
 0xb34   :  { %v2044_v8 = vadd.f32 %v2043_v26, %v2042_v21 }
 0xb36   :  { %v2045_v20 = vrot.slane %v2044_v8, 1 }
 0xb38   :  { %v2046_v28 = vadd.f32 %v2045_v20, %v2044_v8 }
 0xb3a   :  { %2047 = vst [vmem:[#allocation2] sm:$0x1] %v2046_v28 }
 0xb3b   :  { %2861 = shalt.err (!%p2858_p4)
}
 0xb3c   :  { %2057 = dma.vmem_to_hbm [thread:$0]  %s2055_s30, 16, %s4187_s5, [#allocation3]  }
 0xb3d   :  { %2870 = dma.done.wait [#allocation3], 16  }
 0xb3e   :  { %2871 = vsyncadd [#allocation3], 4294967280 }
 0xb3f   :  { %2061 = vsyncpa [#allocation3], 1 }

</bundles_post_ra>
